<compile_context>
chip_gen: v7x
topology: tpu7x:2x2x1
jax: 0.10.0
libtpu: 0.0.40
codegen_flags: <defaults>
</compile_context>

<pallas_src>
import functools

import jax
import jax.numpy as jnp
from jax.experimental import pallas as pl
from jax.experimental.pallas import tpu as pltpu

_LANE = 128


def _embedding_kernel(x_ref, o_ref, *, freq_bands):
    """Embed one lane-dense tile.

    x_ref : (TM, 128)        VMEM tile of flattened input coordinates
    o_ref : (K, TM, 128)     K = 1 + 2*N_freqs stacked output slabs
    """
    x = x_ref[...].astype(jnp.float32)
    # Part 0: the identity copy.
    o_ref[0] = x.astype(o_ref.dtype)
    # freq_bands is a static Python tuple -> loop fully unrolled at trace time.
    # Each part is stored immediately, keeping the live-vreg count small and
    # every store a full 128-lane (unmasked) vst.
    for i, f in enumerate(freq_bands):
        fx = f * x
        o_ref[1 + 2 * i] = jnp.sin(fx).astype(o_ref.dtype)
        o_ref[2 + 2 * i] = jnp.cos(fx).astype(o_ref.dtype)


def embedding(x, N_freqs=8, logscale=True, *, row_tile=512):
    """Pallas equivalent of Embedding.forward for 2-D input x of shape (N, C)."""
    N, C = x.shape
    K = 1 + 2 * N_freqs
    out_c = C * K

    if logscale:
        freq_bands = tuple(float(2.0 ** i) for i in range(N_freqs))
    else:
        freq_bands = tuple(
            float(v) for v in jnp.linspace(1.0, 2.0 ** (N_freqs - 1), N_freqs)
        )

    total = N * C
    # Lane-dense view: rows of 128 coordinates each.
    R = pl.cdiv(total, _LANE)
    # Adapt the tile so tiny inputs don't pay for a huge padded tile; keep it a
    # multiple of 8 sublanes.
    tm = min(row_tile, ((R + 7) // 8) * 8)
    tm = max(8, ((tm + 7) // 8) * 8)
    r_pad = pl.cdiv(R, tm) * tm
    grid = r_pad // tm

    x_flat = x.reshape(-1)
    pad = r_pad * _LANE - total
    if pad:
        x_flat = jnp.pad(x_flat, (0, pad))
    x2d = x_flat.reshape(r_pad, _LANE)

    kernel = functools.partial(_embedding_kernel, freq_bands=freq_bands)

    itemsize = jnp.dtype(x.dtype).itemsize
    out = pl.pallas_call(
        kernel,
        out_shape=jax.ShapeDtypeStruct((K, r_pad, _LANE), x.dtype),
        grid_spec=pltpu.PrefetchScalarGridSpec(
            num_scalar_prefetch=0,
            grid=(grid,),
            in_specs=[pl.BlockSpec((tm, _LANE), lambda i: (i, 0))],
            out_specs=pl.BlockSpec((K, tm, _LANE), lambda i: (0, i, 0)),
        ),
        compiler_params=pltpu.CompilerParams(
            dimension_semantics=("parallel",),
        ),
        cost_estimate=pl.CostEstimate(
            flops=N_freqs * total,                      # f * x multiplies
            transcendentals=2 * N_freqs * total,        # sin + cos
            bytes_accessed=(1 + K) * total * itemsize,  # read x, write K slabs
        ),
    )(x2d)

    # Back to the PyTorch layout: (K, r_pad*128) -> (K, N*C) -> (N, K, C) -> (N, K*C)
    out = out.reshape(K, r_pad * _LANE)[:, :total].reshape(K, N, C)
    out = jnp.transpose(out, (1, 0, 2)).reshape(N, out_c)
    return out


def embedding_ref(x, N_freqs=8, logscale=True):
    """Pure-JAX reference matching the PyTorch forward exactly."""
    if logscale:
        freq_bands = 2.0 ** jnp.linspace(0, N_freqs - 1, N_freqs)
    else:
        freq_bands = jnp.linspace(1.0, 2.0 ** (N_freqs - 1), N_freqs)
    out = [x]
    for f in freq_bands:
        for func in (jnp.sin, jnp.cos):
            out.append(func(f * x))
    return jnp.concatenate(out, axis=-1)


if __name__ == "__main__":
    key = jax.random.PRNGKey(0)

    # Small, NeRF-like shape: 256 points with 3 coordinates each.
    x = jax.random.normal(key, (256, 3), dtype=jnp.float32)
    out = jax.block_until_ready(embedding(x, N_freqs=8, logscale=True))
    ref = embedding_ref(x, N_freqs=8, logscale=True)
    assert out.shape == ref.shape == (256, 3 * (1 + 2 * 8))
    assert jnp.allclose(out, ref, atol=1e-5, rtol=1e-5)

    # Ragged N (not a multiple of the tile) exercises the padding path.
    x2 = jax.random.normal(jax.random.PRNGKey(1), (100, 3), dtype=jnp.float32)
    out2 = jax.block_until_ready(embedding(x2, N_freqs=8, logscale=True))
    ref2 = embedding_ref(x2, N_freqs=8, logscale=True)
    assert out2.shape == ref2.shape == (100, 3 * (1 + 2 * 8))
    assert jnp.allclose(out2, ref2, atol=1e-5, rtol=1e-5)

    print("KERNEL_OK")
</pallas_src>

<mosaic_0001>
module attributes {stable_mosaic.version = 11 : i64} {
  func.func @_embedding_kernel(%arg0: i32, %arg1: memref<8x128xf32, #tpu.memory_space<vmem>>, %arg2: memref<17x8x128xf32, #tpu.memory_space<vmem>>) attributes {dimension_semantics = [#tpu.dimension_semantics<parallel>], iteration_bounds = array<i64: 1>, scalar_prefetch = 0 : i64, scratch_operands = 0 : i64, tpu.core_type = #tpu.core_type<tc>, window_params = [{transform_indices = @transform_0, window_bounds = array<i64: 8, 128>}, {transform_indices = @transform_1, window_bounds = array<i64: 17, 8, 128>}]} {
    %c0 = arith.constant 0 : index
    %c0_0 = arith.constant 0 : index
    %0 = vector.load %arg1[%c0, %c0_0] : memref<8x128xf32, #tpu.memory_space<vmem>>, vector<8x128xf32>
    %c0_1 = arith.constant 0 : index
    %c0_2 = arith.constant 0 : index
    %c0_3 = arith.constant 0 : index
    %1 = vector.load %arg2[%c0_1, %c0_2, %c0_3] : memref<17x8x128xf32, #tpu.memory_space<vmem>>, vector<1x8x128xf32>
    %2 = vector.shape_cast %1 : vector<1x8x128xf32> to vector<8x128xf32>
    %3 = vector.shape_cast %0 : vector<8x128xf32> to vector<1x8x128xf32>
    tpu.vector_store %arg2[%c0_1, %c0_2, %c0_3], %3 {strides = array<i32>} : memref<17x8x128xf32, #tpu.memory_space<vmem>>, vector<1x8x128xf32>,
    %cst = arith.constant 1.000000e+00 : f32
    %4 = vector.broadcast %cst : f32 to vector<8x128xf32>
    %5 = arith.mulf %4, %0 : vector<8x128xf32>
    %6 = math.sin %5 : vector<8x128xf32>
    %c1 = arith.constant 1 : index
    %c0_4 = arith.constant 0 : index
    %c0_5 = arith.constant 0 : index
    %7 = vector.load %arg2[%c1, %c0_4, %c0_5] : memref<17x8x128xf32, #tpu.memory_space<vmem>>, vector<1x8x128xf32>
    %8 = vector.shape_cast %7 : vector<1x8x128xf32> to vector<8x128xf32>
    %9 = vector.shape_cast %6 : vector<8x128xf32> to vector<1x8x128xf32>
    tpu.vector_store %arg2[%c1, %c0_4, %c0_5], %9 {strides = array<i32>} : memref<17x8x128xf32, #tpu.memory_space<vmem>>, vector<1x8x128xf32>,
    %10 = math.cos %5 : vector<8x128xf32>
    %c2 = arith.constant 2 : index
    %c0_6 = arith.constant 0 : index
    %c0_7 = arith.constant 0 : index
    %11 = vector.load %arg2[%c2, %c0_6, %c0_7] : memref<17x8x128xf32, #tpu.memory_space<vmem>>, vector<1x8x128xf32>
    %12 = vector.shape_cast %11 : vector<1x8x128xf32> to vector<8x128xf32>
    %13 = vector.shape_cast %10 : vector<8x128xf32> to vector<1x8x128xf32>
    tpu.vector_store %arg2[%c2, %c0_6, %c0_7], %13 {strides = array<i32>} : memref<17x8x128xf32, #tpu.memory_space<vmem>>, vector<1x8x128xf32>,
    %cst_8 = arith.constant 2.000000e+00 : f32
    %14 = vector.broadcast %cst_8 : f32 to vector<8x128xf32>
    %15 = arith.mulf %14, %0 : vector<8x128xf32>
    %16 = math.sin %15 : vector<8x128xf32>
    %c3 = arith.constant 3 : index
    %c0_9 = arith.constant 0 : index
    %c0_10 = arith.constant 0 : index
    %17 = vector.load %arg2[%c3, %c0_9, %c0_10] : memref<17x8x128xf32, #tpu.memory_space<vmem>>, vector<1x8x128xf32>
    %18 = vector.shape_cast %17 : vector<1x8x128xf32> to vector<8x128xf32>
    %19 = vector.shape_cast %16 : vector<8x128xf32> to vector<1x8x128xf32>
    tpu.vector_store %arg2[%c3, %c0_9, %c0_10], %19 {strides = array<i32>} : memref<17x8x128xf32, #tpu.memory_space<vmem>>, vector<1x8x128xf32>,
    %20 = math.cos %15 : vector<8x128xf32>
    %c4 = arith.constant 4 : index
    %c0_11 = arith.constant 0 : index
    %c0_12 = arith.constant 0 : index
    %21 = vector.load %arg2[%c4, %c0_11, %c0_12] : memref<17x8x128xf32, #tpu.memory_space<vmem>>, vector<1x8x128xf32>
    %22 = vector.shape_cast %21 : vector<1x8x128xf32> to vector<8x128xf32>
    %23 = vector.shape_cast %20 : vector<8x128xf32> to vector<1x8x128xf32>
    tpu.vector_store %arg2[%c4, %c0_11, %c0_12], %23 {strides = array<i32>} : memref<17x8x128xf32, #tpu.memory_space<vmem>>, vector<1x8x128xf32>,
    %cst_13 = arith.constant 4.000000e+00 : f32
    %24 = vector.broadcast %cst_13 : f32 to vector<8x128xf32>
    %25 = arith.mulf %24, %0 : vector<8x128xf32>
    %26 = math.sin %25 : vector<8x128xf32>
    %c5 = arith.constant 5 : index
    %c0_14 = arith.constant 0 : index
    %c0_15 = arith.constant 0 : index
    %27 = vector.load %arg2[%c5, %c0_14, %c0_15] : memref<17x8x128xf32, #tpu.memory_space<vmem>>, vector<1x8x128xf32>
    %28 = vector.shape_cast %27 : vector<1x8x128xf32> to vector<8x128xf32>
    %29 = vector.shape_cast %26 : vector<8x128xf32> to vector<1x8x128xf32>
    tpu.vector_store %arg2[%c5, %c0_14, %c0_15], %29 {strides = array<i32>} : memref<17x8x128xf32, #tpu.memory_space<vmem>>, vector<1x8x128xf32>,
    %30 = math.cos %25 : vector<8x128xf32>
    %c6 = arith.constant 6 : index
    %c0_16 = arith.constant 0 : index
    %c0_17 = arith.constant 0 : index
    %31 = vector.load %arg2[%c6, %c0_16, %c0_17] : memref<17x8x128xf32, #tpu.memory_space<vmem>>, vector<1x8x128xf32>
    %32 = vector.shape_cast %31 : vector<1x8x128xf32> to vector<8x128xf32>
    %33 = vector.shape_cast %30 : vector<8x128xf32> to vector<1x8x128xf32>
    tpu.vector_store %arg2[%c6, %c0_16, %c0_17], %33 {strides = array<i32>} : memref<17x8x128xf32, #tpu.memory_space<vmem>>, vector<1x8x128xf32>,
    %cst_18 = arith.constant 8.000000e+00 : f32
    %34 = vector.broadcast %cst_18 : f32 to vector<8x128xf32>
    %35 = arith.mulf %34, %0 : vector<8x128xf32>
    %36 = math.sin %35 : vector<8x128xf32>
    %c7 = arith.constant 7 : index
    %c0_19 = arith.constant 0 : index
    %c0_20 = arith.constant 0 : index
    %37 = vector.load %arg2[%c7, %c0_19, %c0_20] : memref<17x8x128xf32, #tpu.memory_space<vmem>>, vector<1x8x128xf32>
    %38 = vector.shape_cast %37 : vector<1x8x128xf32> to vector<8x128xf32>
    %39 = vector.shape_cast %36 : vector<8x128xf32> to vector<1x8x128xf32>
    tpu.vector_store %arg2[%c7, %c0_19, %c0_20], %39 {strides = array<i32>} : memref<17x8x128xf32, #tpu.memory_space<vmem>>, vector<1x8x128xf32>,
    %40 = math.cos %35 : vector<8x128xf32>
    %c8 = arith.constant 8 : index
    %c0_21 = arith.constant 0 : index
    %c0_22 = arith.constant 0 : index
    %41 = vector.load %arg2[%c8, %c0_21, %c0_22] : memref<17x8x128xf32, #tpu.memory_space<vmem>>, vector<1x8x128xf32>
    %42 = vector.shape_cast %41 : vector<1x8x128xf32> to vector<8x128xf32>
    %43 = vector.shape_cast %40 : vector<8x128xf32> to vector<1x8x128xf32>
    tpu.vector_store %arg2[%c8, %c0_21, %c0_22], %43 {strides = array<i32>} : memref<17x8x128xf32, #tpu.memory_space<vmem>>, vector<1x8x128xf32>,
    %cst_23 = arith.constant 1.600000e+01 : f32
    %44 = vector.broadcast %cst_23 : f32 to vector<8x128xf32>
    %45 = arith.mulf %44, %0 : vector<8x128xf32>
    %46 = math.sin %45 : vector<8x128xf32>
    %c9 = arith.constant 9 : index
    %c0_24 = arith.constant 0 : index
    %c0_25 = arith.constant 0 : index
    %47 = vector.load %arg2[%c9, %c0_24, %c0_25] : memref<17x8x128xf32, #tpu.memory_space<vmem>>, vector<1x8x128xf32>
    %48 = vector.shape_cast %47 : vector<1x8x128xf32> to vector<8x128xf32>
    %49 = vector.shape_cast %46 : vector<8x128xf32> to vector<1x8x128xf32>
    tpu.vector_store %arg2[%c9, %c0_24, %c0_25], %49 {strides = array<i32>} : memref<17x8x128xf32, #tpu.memory_space<vmem>>, vector<1x8x128xf32>,
    %50 = math.cos %45 : vector<8x128xf32>
    %c10 = arith.constant 10 : index
    %c0_26 = arith.constant 0 : index
    %c0_27 = arith.constant 0 : index
    %51 = vector.load %arg2[%c10, %c0_26, %c0_27] : memref<17x8x128xf32, #tpu.memory_space<vmem>>, vector<1x8x128xf32>
    %52 = vector.shape_cast %51 : vector<1x8x128xf32> to vector<8x128xf32>
    %53 = vector.shape_cast %50 : vector<8x128xf32> to vector<1x8x128xf32>
    tpu.vector_store %arg2[%c10, %c0_26, %c0_27], %53 {strides = array<i32>} : memref<17x8x128xf32, #tpu.memory_space<vmem>>, vector<1x8x128xf32>,
    %cst_28 = arith.constant 3.200000e+01 : f32
    %54 = vector.broadcast %cst_28 : f32 to vector<8x128xf32>
    %55 = arith.mulf %54, %0 : vector<8x128xf32>
    %56 = math.sin %55 : vector<8x128xf32>
    %c11 = arith.constant 11 : index
    %c0_29 = arith.constant 0 : index
    %c0_30 = arith.constant 0 : index
    %57 = vector.load %arg2[%c11, %c0_29, %c0_30] : memref<17x8x128xf32, #tpu.memory_space<vmem>>, vector<1x8x128xf32>
    %58 = vector.shape_cast %57 : vector<1x8x128xf32> to vector<8x128xf32>
    %59 = vector.shape_cast %56 : vector<8x128xf32> to vector<1x8x128xf32>
    tpu.vector_store %arg2[%c11, %c0_29, %c0_30], %59 {strides = array<i32>} : memref<17x8x128xf32, #tpu.memory_space<vmem>>, vector<1x8x128xf32>,
    %60 = math.cos %55 : vector<8x128xf32>
    %c12 = arith.constant 12 : index
    %c0_31 = arith.constant 0 : index
    %c0_32 = arith.constant 0 : index
    %61 = vector.load %arg2[%c12, %c0_31, %c0_32] : memref<17x8x128xf32, #tpu.memory_space<vmem>>, vector<1x8x128xf32>
    %62 = vector.shape_cast %61 : vector<1x8x128xf32> to vector<8x128xf32>
    %63 = vector.shape_cast %60 : vector<8x128xf32> to vector<1x8x128xf32>
    tpu.vector_store %arg2[%c12, %c0_31, %c0_32], %63 {strides = array<i32>} : memref<17x8x128xf32, #tpu.memory_space<vmem>>, vector<1x8x128xf32>,
    %cst_33 = arith.constant 6.400000e+01 : f32
    %64 = vector.broadcast %cst_33 : f32 to vector<8x128xf32>
    %65 = arith.mulf %64, %0 : vector<8x128xf32>
    %66 = math.sin %65 : vector<8x128xf32>
    %c13 = arith.constant 13 : index
    %c0_34 = arith.constant 0 : index
    %c0_35 = arith.constant 0 : index
    %67 = vector.load %arg2[%c13, %c0_34, %c0_35] : memref<17x8x128xf32, #tpu.memory_space<vmem>>, vector<1x8x128xf32>
    %68 = vector.shape_cast %67 : vector<1x8x128xf32> to vector<8x128xf32>
    %69 = vector.shape_cast %66 : vector<8x128xf32> to vector<1x8x128xf32>
    tpu.vector_store %arg2[%c13, %c0_34, %c0_35], %69 {strides = array<i32>} : memref<17x8x128xf32, #tpu.memory_space<vmem>>, vector<1x8x128xf32>,
    %70 = math.cos %65 : vector<8x128xf32>
    %c14 = arith.constant 14 : index
    %c0_36 = arith.constant 0 : index
    %c0_37 = arith.constant 0 : index
    %71 = vector.load %arg2[%c14, %c0_36, %c0_37] : memref<17x8x128xf32, #tpu.memory_space<vmem>>, vector<1x8x128xf32>
    %72 = vector.shape_cast %71 : vector<1x8x128xf32> to vector<8x128xf32>
    %73 = vector.shape_cast %70 : vector<8x128xf32> to vector<1x8x128xf32>
    tpu.vector_store %arg2[%c14, %c0_36, %c0_37], %73 {strides = array<i32>} : memref<17x8x128xf32, #tpu.memory_space<vmem>>, vector<1x8x128xf32>,
    %cst_38 = arith.constant 1.280000e+02 : f32
    %74 = vector.broadcast %cst_38 : f32 to vector<8x128xf32>
    %75 = arith.mulf %74, %0 : vector<8x128xf32>
    %76 = math.sin %75 : vector<8x128xf32>
    %c15 = arith.constant 15 : index
    %c0_39 = arith.constant 0 : index
    %c0_40 = arith.constant 0 : index
    %77 = vector.load %arg2[%c15, %c0_39, %c0_40] : memref<17x8x128xf32, #tpu.memory_space<vmem>>, vector<1x8x128xf32>
    %78 = vector.shape_cast %77 : vector<1x8x128xf32> to vector<8x128xf32>
    %79 = vector.shape_cast %76 : vector<8x128xf32> to vector<1x8x128xf32>
    tpu.vector_store %arg2[%c15, %c0_39, %c0_40], %79 {strides = array<i32>} : memref<17x8x128xf32, #tpu.memory_space<vmem>>, vector<1x8x128xf32>,
    %80 = math.cos %75 : vector<8x128xf32>
    %c16 = arith.constant 16 : index
    %c0_41 = arith.constant 0 : index
    %c0_42 = arith.constant 0 : index
    %81 = vector.load %arg2[%c16, %c0_41, %c0_42] : memref<17x8x128xf32, #tpu.memory_space<vmem>>, vector<1x8x128xf32>
    %82 = vector.shape_cast %81 : vector<1x8x128xf32> to vector<8x128xf32>
    %83 = vector.shape_cast %80 : vector<8x128xf32> to vector<1x8x128xf32>
    tpu.vector_store %arg2[%c16, %c0_41, %c0_42], %83 {strides = array<i32>} : memref<17x8x128xf32, #tpu.memory_space<vmem>>, vector<1x8x128xf32>,
    return
  }
  func.func @transform_0(%arg0: i32) -> (i32, i32) {
    %c0_i32 = arith.constant 0 : i32
    %c0_i32_0 = arith.constant 0 : i32
    return %arg0, %c0_i32 : i32, i32
  }
  func.func @transform_1(%arg0: i32) -> (i32, i32, i32) {
    %c0_i32 = arith.constant 0 : i32
    %c0_i32_0 = arith.constant 0 : i32
    %c0_i32_1 = arith.constant 0 : i32
    return %c0_i32, %arg0, %c0_i32_0 : i32, i32, i32
  }
}

</mosaic_0001>

<bundles_post_ra>
// kernel: tpu_custom_call.1
= control target key start
LH: loop header
LB: loop body
LE: loop exit
PB: predicated region body
PF: predicated region fallthrough
CT: control target
= control target key end

     0   :  { %6 = vsyncpa [#allocation3], 0  ;;  %s2672_s0 = inlined_call_operand.hbm [shape: f32[8,128], index: 0, kind: input, shape index: {}]   ;;  %s2673_s1 = inlined_call_operand.hbm [shape: f32[17,8,128], index: 1, kind: output, shape index: {}]  }
   0x1   :  { %7 = vsyncpa [#allocation4], 0  ;;  %s1922_s6 = smov [#allocation2]   ;;  %s1874_s10 = scalar_lea.hbm %s2672_s0, 128 }
   0x2   :  { %s14_s7 = sshll.u32 %s1922_s6, 4  ;;  %p1875_p0 = scmp.ne.s32.totalorder %s2672_s0, %s1874_s10  ;;  %s15_s7 = int_to_ptr.vmem [resolvable:$true] %s14_s7 }
   0x3   :  { %p1878_p1 = scmp.lt.u32.totalorder %s1874_s10, %s2672_s0 }
   0x5   :  { %p1880_p2 = pnand %p1878_p1, %p1875_p0 }
   0x7   :  { %1883 = shalt.err (!%p1880_p2)
}
   0x8   :  { %s1884_s15 = scalar_lea.vmem %s15_s7, 128  ;;  %p1889_p4 = scmp.lt.s32.totalorder %s15_s7, %s15_s7 }
   0x9   :  { %p1885_p3 = scmp.ne.s32.totalorder %s15_s7, %s1884_s15  ;;  %p1890_p5 = scmp.lt.s32.totalorder %s1884_s15, %s1884_s15 }
   0xb   :  { %p1891_p6 = por %p1890_p5, %p1889_p4 }
   0xd   :  { %p1892_p7 = pnand %p1891_p6, %p1885_p3 }
   0xf   :  { %1895 = shalt.err (!%p1892_p7)
}
  0x10   :  { %17 = dma.hbm_to_vmem [thread:$0]  %s2672_s0, 128, %s15_s7, [#allocation3]  }
  0x11   :  { %1918 = dma.done.wait [#allocation3], 128  }
  0x12   :  { %1919 = vsyncadd [#allocation3], 4294967168  ;;  %v1954_v0 = vld [vmem:[#allocation2] sm:$0xff]  ;;  %v1923_v26 = vmov 683565275   ;;  %s1929_s0 = smov [#allocation5]  }
  0x13   :  { %22 = vst [vmem:[#allocation5] sm:$0xff] %v1954_v0  ;;  %v23_v1 = vand.u32 2147483647, %v1954_v0  ;;  %v26_v2 = vand.u32 2139095040, %v1954_v0  ;;  %v1960_v3 = vmul.f32 2.0, %v1954_v0  ;;  %v1963_v4 = vmul.f32 4.0, %v1954_v0 }
  0x14   :  { %v1924_v28 = vmov 2475754826   ;;  %v1925_v30 = vmov 2131351028   ;;  %v1926_v32 = vmov 2102212464  }
  0x15   :  { %v27_v5 = vshrl.u32 %v26_v2, 23  ;;  %v30_v6 = vand.u32 8388607, %v23_v1  ;;  %v235_v7 = vand.u32 2147483647, %v1960_v3  ;;  %v238_v8 = vand.u32 2139095040, %v1960_v3 }
  0x16   :  { %v450_v12 = vand.u32 2139095040, %v1963_v4  ;;  %v1927_v34 = vmov 920167782   ;;  %v1928_v41 = vmov 1326507024   ;;  %vm25_vm13 = vcmp.lt.s32.totalorder %v1954_v0, 0 }
  0x17   :  { %v1735_v9 = vadd.s32 4294967169, %v27_v5  ;;  %v239_v10 = vshrl.u32 %v238_v8, 23  ;;  %v242_v11 = vand.u32 8388607, %v235_v7  ;;  %v31_v14 = vor.u32 8388608, %v30_v6  ;;  %s1723_s18 = sshll.u32 %s1929_s0, 4  ;;  %s1724_s18 = int_to_ptr.vmem [resolvable:$true] %s1723_s18 }
  0x18   :  { %v451_v17 = vshrl.u32 %v450_v12, 23  ;;  %vm2056_vm14 = vcmp.le.f32.partialorder %v23_v1, 0.7853982  ;;  %s1896_s19 = scalar_lea.vmem %s1724_s18, 2176  ;;  %p1901_p9 = scmp.lt.s32.totalorder %s1724_s18, %s1724_s18 }
  0x19   :  { %v33_v13 = vadd.s32 1, %v1735_v9  ;;  %v1743_v15 = vadd.s32 4294967169, %v239_v10  ;;  %v243_v16 = vor.u32 8388608, %v242_v11  ;;  %v1972_v22 = vshll.u32 %v31_v14, 8  ;;  %p1897_p8 = scmp.ne.s32.totalorder %s1724_s18, %s1896_s19  ;;  %p1902_p10 = scmp.lt.s32.totalorder %s1896_s19, %s1896_s19 }
  0x1a   :  { %v1976_v24 = vadd.s32 4294967169, %v451_v17 }
  0x1b   :  { %vm34_vm0 = vcmp.gt.s32.totalorder %v33_v13, 0  ;;  %v245_v19 = vadd.s32 1, %v1743_v15  ;;  %v1974_v23 = vshll.u32 %v243_v16, 8  ;;  %p1903_p11 = por %p1902_p10, %p1901_p9 }
  0x1c   :  { %v35_v18 = vsel %vm34_vm0, %v33_v13, 0  ;;  %vm237_vm0 = vcmp.lt.s32.totalorder %v1960_v3, 0 }
  0x1d   :  { %v36_v20 = vshrl.u32 %v35_v18, 5  ;;  %v37_v21 = vand.u32 31, %v35_v18  ;;  %vm246_vm1 = vcmp.gt.s32.totalorder %v245_v19, 0  ;;  %p1904_p12 = pnand %p1903_p11, %p1897_p8 }
  0x1e   :  { %v247_v46 = vsel %vm246_vm1, %v245_v19, 0 }
  0x1f   :  { %v38_v25 = vsub.s32 32, %v37_v21  ;;  %v40_v27 = vshll.u32 %v1923_v26, %v37_v21  ;;  %v43_v29 = vshll.u32 %v1924_v28, %v37_v21  ;;  %v46_v31 = vshll.u32 %v1925_v30, %v37_v21 }
  0x20   :  { %v49_v33 = vshll.u32 %v1926_v32, %v37_v21  ;;  %v52_v35 = vshll.u32 %v1927_v34, %v37_v21  ;;  %vm55_vm2 = vcmp.lt.s32.totalorder %v36_v20, 1  ;;  %vm56_vm3 = vcmp.lt.s32.totalorder %v36_v20, 2 }
  0x21   :  { %v39_v36 = vshrl.u32 %v1923_v26, %v38_v25  ;;  %v41_v37 = vshrl.u32 %v1924_v28, %v38_v25  ;;  %v44_v38 = vshrl.u32 %v1925_v30, %v38_v25  ;;  %v47_v39 = vshrl.u32 %v1926_v32, %v38_v25 }
  0x22   :  { %v50_v40 = vshrl.u32 %v1927_v34, %v38_v25  ;;  %v53_v42 = vshrl.u32 %v1928_v41, %v38_v25  ;;  %vm57_vm4 = vcmp.lt.s32.totalorder %v36_v20, 3  ;;  %vm58_vm5 = vcmp.lt.s32.totalorder %v36_v20, 4 }
  0x23   :  { %v42_v43 = vor.u32 %v41_v37, %v40_v27  ;;  %v45_v44 = vor.u32 %v44_v38, %v43_v29  ;;  %v48_v45 = vor.u32 %v47_v39, %v46_v31  ;;  %v248_v49 = vshrl.u32 %v247_v46, 5 }
  0x24   :  { %v51_v47 = vor.u32 %v50_v40, %v49_v33  ;;  %v54_v48 = vor.u32 %v53_v42, %v52_v35  ;;  %v249_v50 = vand.u32 31, %v247_v46  ;;  %v457_v29 = vadd.s32 1, %v1976_v24 }
  0x25   :  { %v59_v51 = vsel %vm55_vm2, %v39_v36, %v42_v43  ;;  %v60_v52 = vsel %vm58_vm5, %v48_v45, 2102212464  ;;  %v63_v53 = vsel %vm55_vm2, %v42_v43, %v45_v44  ;;  %v67_v54 = vsel %vm55_vm2, %v45_v44, %v48_v45 }
  0x26   :  { %v61_v55 = vsel %vm57_vm4, %v45_v44, %v60_v52  ;;  %v64_v56 = vsel %vm58_vm5, %v51_v47, 920167782  ;;  %v68_v57 = vsel %vm58_vm5, %v54_v48, 1326507024  ;;  %v250_v58 = vsub.s32 32, %v249_v50 }
  0x27   :  { %v62_v59 = vsel %vm56_vm3, %v59_v51, %v61_v55  ;;  %v65_v60 = vsel %vm57_vm4, %v48_v45, %v64_v56  ;;  %v69_v61 = vsel %vm57_vm4, %v51_v47, %v68_v57  ;;  %v252_v62 = vshll.u32 %v1923_v26, %v249_v50 }
  0x28   :  { %v66_v63 = vsel %vm56_vm3, %v63_v53, %v65_v60  ;;  %v70_v2 = vsel %vm56_vm3, %v67_v54, %v69_v61  ;;  %v78_v5 = vmul.u32 %v1972_v22, %v62_v59  ;;  %v251_v6 = vshrl.u32 %v1923_v26, %v250_v58 }
  0x29   :  { %v2003_v8 = vmul.u32.u64.low %v1972_v22, %v70_v2  ;;  %v2004_v9 = vmul.u32.u64.high %v1972_v22, %v70_v2, %v2003_v8  ;;  %v2007_v10 = vmul.u32.u64.low %v1972_v22, %v66_v63  ;;  %v2008_v11 = vmul.u32.u64.high %v1972_v22, %v66_v63, %v2007_v10 }
  0x2a   :  { %v253_v12 = vshrl.u32 %v1924_v28, %v250_v58  ;;  %v255_v13 = vshll.u32 %v1924_v28, %v249_v50  ;;  %v256_v14 = vshrl.u32 %v1925_v30, %v250_v58  ;;  %v258_v15 = vshll.u32 %v1925_v30, %v249_v50 }
  0x2b   :  { %v259_v16 = vshrl.u32 %v1926_v32, %v250_v58  ;;  %v261_v17 = vshll.u32 %v1926_v32, %v249_v50  ;;  %v262_v18 = vshrl.u32 %v1927_v34, %v250_v58  ;;  %v264_v19 = vshll.u32 %v1927_v34, %v249_v50 }
  0x2c   :  { %v254_v20 = vor.u32 %v253_v12, %v252_v62  ;;  %v257_v21 = vor.u32 %v256_v14, %v255_v13  ;;  %v265_v22 = vshrl.u32 %v1928_v41, %v250_v58  ;;  %vm267_vm6 = vcmp.lt.s32.totalorder %v248_v49, 1 }
  0x2d   :  { %vm80_vm7 = vc.u32 %v2004_v9, %v2007_v10  ;;  %v81_v25 = vadd.s32 1, %v2008_v11  ;;  %v260_v27 = vor.u32 %v259_v16, %v258_v15  ;;  %v263_v31 = vor.u32 %v262_v18, %v261_v17 }
  0x2e   :  { %v266_v33 = vor.u32 %v265_v22, %v264_v19  ;;  %vm268_vm8 = vcmp.lt.s32.totalorder %v248_v49, 2  ;;  %vm269_vm9 = vcmp.lt.s32.totalorder %v248_v49, 3  ;;  %vm270_vm10 = vcmp.lt.s32.totalorder %v248_v49, 4 }
  0x2f   :  { %v82_v35 = vsel %vm80_vm7, %v81_v25, %v2008_v11  ;;  %v271_v36 = vsel %vm267_vm6, %v251_v6, %v254_v20  ;;  %v275_v37 = vsel %vm267_vm6, %v254_v20, %v257_v21  ;;  %v272_v39 = vsel %vm270_vm10, %v260_v27, 2102212464 }
  0x30   :  { %v83_v38 = vadd.s32 %v82_v35, %v78_v5  ;;  %v276_v40 = vsel %vm270_vm10, %v263_v31, 920167782  ;;  %v279_v42 = vsel %vm267_vm6, %v257_v21, %v260_v27  ;;  %v273_v43 = vsel %vm269_vm9, %v257_v21, %v272_v39 }
  0x31   :  { %v277_v44 = vsel %vm269_vm9, %v260_v27, %v276_v40  ;;  %v280_v45 = vsel %vm270_vm10, %v266_v33, 1326507024  ;;  %vm458_vm11 = vcmp.gt.s32.totalorder %v457_v29, 0  ;;  %v447_v48 = vand.u32 2147483647, %v1963_v4 }
  0x32   :  { %v84_v24 = vadd.s32 536870912, %v83_v38  ;;  %v278_v46 = vsel %vm268_vm8, %v275_v37, %v277_v44  ;;  %v281_v47 = vsel %vm269_vm9, %v263_v31, %v280_v45  ;;  %v274_v50 = vsel %vm268_vm8, %v271_v36, %v273_v43 }
  0x33   :  { %v282_v51 = vsel %vm268_vm8, %v279_v42, %v281_v47  ;;  %v2033_v52 = vmul.u32.u64.low %v1974_v23, %v278_v46  ;;  %v2034_v53 = vmul.u32.u64.high %v1974_v23, %v278_v46, %v2033_v52  ;;  %v459_v57 = vsel %vm458_vm11, %v457_v29, 0 }
  0x34   :  { %v85_v54 = vshrl.u32 %v84_v24, 30  ;;  %v2037_v55 = vmul.u32.u64.low %v1974_v23, %v282_v51  ;;  %v2038_v56 = vmul.u32.u64.high %v1974_v23, %v282_v51, %v2037_v55  ;;  %v461_v58 = vand.u32 31, %v459_v57 }
  0x35   :  { %v290_v60 = vmul.u32 %v1974_v23, %v274_v50  ;;  %v293_v61 = vadd.s32 1, %v2034_v53  ;;  %v454_v49 = vand.u32 8388607, %v447_v48  ;;  %v2046_v63 = vmul.f32 8.0, %v1954_v0 }
  0x36   :  { %v86_v59 = vshll.u32 %v85_v54, 30  ;;  %vm292_vm12 = vc.u32 %v2038_v56, %v2033_v52  ;;  %v109_v2 = vsub.s32 4, %v85_v54  ;;  %v462_v6 = vsub.s32 32, %v461_v58 }
  0x37   :  { %v294_v5 = vsel %vm292_vm12, %v293_v61, %v2034_v53  ;;  %v455_v23 = vor.u32 8388608, %v454_v49  ;;  %v659_v12 = vand.u32 2147483647, %v2046_v63  ;;  %v2052_v13 = vmul.f32 16.0, %v1954_v0 }
  0x38   :  { %v87_v62 = vsub.s32 %v83_v38, %v86_v59  ;;  %v295_v11 = vadd.s32 %v294_v5, %v290_v60  ;;  %v464_v16 = vshll.u32 %v1923_v26, %v461_v58  ;;  %v662_v17 = vand.u32 2139095040, %v2046_v63 }
  0x39   :  { %v110_v18 = vsel %vm25_vm13, %v109_v2, %v85_v54  ;;  %v465_v20 = vshrl.u32 %v1924_v28, %v462_v6  ;;  %v467_v21 = vshll.u32 %v1924_v28, %v461_v58  ;;  %v468_v25 = vshrl.u32 %v1925_v30, %v462_v6 }
  0x3a   :  { %v89_v8 = vsub.s32 0, %v87_v62  ;;  %v296_v19 = vadd.s32 536870912, %v295_v11  ;;  %v470_v1 = vshll.u32 %v1925_v30, %v461_v58  ;;  %v471_v27 = vshrl.u32 %v1926_v32, %v462_v6 }
  0x3b   :  { %v79_v29 = vadd.s32 %v2007_v10, %v2004_v9  ;;  %v2071_v33 = vshll.u32 %v455_v23, 8  ;;  %v2075_v35 = vand.u32 8388607, %v659_v12  ;;  %v460_v37 = vshrl.u32 %v459_v57, 5 }
  0x3c   :  { %v1736_v15 = vmin.u32 %v89_v8, %v87_v62  ;;  %v297_v31 = vshrl.u32 %v296_v19, 30  ;;  %v473_v38 = vshll.u32 %v1926_v32, %v461_v58  ;;  %v474_v39 = vshrl.u32 %v1927_v34, %v462_v6 }
  0x3d   :  { %v112_v40 = vsel %vm2056_vm14, 0, %v110_v18  ;;  %v2082_v42 = vadd.s32 %v2033_v52, %v2038_v56  ;;  %v663_v10 = vshrl.u32 %v662_v17, 23  ;;  %v466_v43 = vor.u32 %v465_v20, %v464_v16 }
  0x3e   :  { %v91_v22 = vclz %v1736_v15  ;;  %v298_v9 = vshll.u32 %v297_v31, 30  ;;  %v469_v44 = vor.u32 %v468_v25, %v467_v21  ;;  %v472_v45 = vor.u32 %v471_v27, %v470_v1 }
  0x3f   :  { %v476_v47 = vshll.u32 %v1927_v34, %v461_v58  ;;  %v477_v50 = vshrl.u32 %v1928_v41, %v462_v6  ;;  %v475_v52 = vor.u32 %v474_v39, %v473_v38  ;;  %v463_v56 = vshrl.u32 %v1923_v26, %v462_v6 }
  0x40   :  { %v1737_v36 = vadd.s32 4294967294, %v91_v22  ;;  %v2085_v46 = vsub.s32 %v295_v11, %v298_v9  ;;  %vm479_vm1 = vcmp.lt.s32.totalorder %v460_v37, 1  ;;  %vm482_vm2 = vcmp.lt.s32.totalorder %v460_v37, 4 }
  0x41   :  { %vm480_vm3 = vcmp.lt.s32.totalorder %v460_v37, 2  ;;  %v484_v60 = vsel %vm482_vm2, %v472_v45, 2102212464  ;;  %v321_v58 = vsub.s32 4, %v297_v31  ;;  %v478_v49 = vor.u32 %v477_v50, %v476_v47 }
  0x42   :  { %vm1738_vm15 = vcmp.lt.s32.totalorder %v1737_v36, 0  ;;  %v301_v55 = vsub.s32 0, %v2085_v46  ;;  %vm481_vm4 = vcmp.lt.s32.totalorder %v460_v37, 3  ;;  %vm2095_vm5 = vcmp.le.f32.partialorder %v235_v7, 0.7853982 }
  0x43   :  { %v94_v24 = vsel %vm1738_vm15, 0, %v1737_v36  ;;  %v487_v6 = vsel %vm479_vm1, %v466_v43, %v469_v44  ;;  %v488_v8 = vsel %vm482_vm2, %v475_v52, 920167782  ;;  %v116_v11 = vadd.s32 3, %v112_v40 }
  0x44   :  { %v95_v51 = vsub.s32 32, %v94_v24  ;;  %v96_v53 = vshll.u32 %v87_v62, %v94_v24  ;;  %v99_v54 = vsub.s32 4294967266, %v94_v24  ;;  %v1744_v61 = vmin.u32 %v301_v55, %v2085_v46 }
  0x45   :  { %v483_v15 = vsel %vm479_vm1, %v463_v56, %v466_v43  ;;  %v485_v16 = vsel %vm481_vm4, %v469_v44, %v484_v60  ;;  %v489_v19 = vsel %vm481_vm4, %v472_v45, %v488_v8  ;;  %v491_v20 = vsel %vm479_vm1, %v469_v44, %v472_v45 }
  0x46   :  { %v97_v57 = vshrl.u32 %v79_v29, %v95_v51  ;;  %v100_v59 = vadd.s32 127, %v99_v54  ;;  %v303_v23 = vclz %v1744_v61  ;;  %v322_v21 = vsel %vm237_vm0, %v321_v58, %v297_v31 }
  0x47   :  { %v490_v22 = vsel %vm480_vm3, %v487_v6, %v489_v19  ;;  %v492_v25 = vsel %vm482_vm2, %v478_v49, 1326507024  ;;  %v486_v38 = vsel %vm480_vm3, %v483_v15, %v485_v16  ;;  %v1759_v9 = vadd.s32 4294967169, %v663_v10 }
  0x48   :  { %v98_v2 = vor.u32 %v97_v57, %v96_v53  ;;  %v101_v62 = vshll.u32 %v100_v59, 23  ;;  %v1745_v7 = vadd.s32 4294967294, %v303_v23  ;;  %v493_v27 = vsel %vm481_vm4, %v475_v52, %v492_v25 }
  0x49   :  { %v2111_v29 = vmul.u32.u64.low %v2071_v33, %v490_v22  ;;  %v2112_v36 = vmul.u32.u64.high %v2071_v33, %v490_v22, %v2111_v29  ;;  %v494_v39 = vsel %vm480_vm3, %v491_v20, %v493_v27  ;;  %v669_v51 = vadd.s32 1, %v1759_v9 }
  0x4a   :  { %v102_v17 = vor.u32 4788187, %v101_v62  ;;  %v105_v18 = vcvt.s32.f32 %v98_v2  ;;  %vm1746_vm6 = vcmp.lt.s32.totalorder %v1745_v7, 0  ;;  %v2121_v54 = vand.u32 3, %v112_v40 }
  0x4b   :  { %v306_v44 = vsel %vm1746_vm6, 0, %v1745_v7  ;;  %v2117_v31 = vmul.u32.u64.low %v2071_v33, %v494_v39  ;;  %v2118_v45 = vmul.u32.u64.high %v2071_v33, %v494_v39, %v2117_v31  ;;  %v502_v52 = vmul.u32 %v2071_v33, %v486_v38 }
  0x4c   :  { %v103_v1 = vand.u32 2147483647, %v102_v17  ;;  %v307_v24 = vsub.s32 32, %v306_v44  ;;  %v308_v47 = vshll.u32 %v2085_v46, %v306_v44  ;;  %v311_v50 = vsub.s32 4294967266, %v306_v44 }
  0x4d   :  { %v505_v37 = vadd.s32 1, %v2112_v36  ;;  %v324_v56 = vsel %vm2095_vm5, 0, %v322_v21  ;;  %vm670_vm7 = vcmp.gt.s32.totalorder %v669_v51, 0  ;;  %v2130_v46 = vand.u32 3, %v116_v11 }
  0x4e   :  { %v106_v43 = vmul.f32 %v105_v18, %v103_v1  ;;  %v309_v10 = vshrl.u32 %v2082_v42, %v307_v24  ;;  %v312_v55 = vadd.s32 127, %v311_v50  ;;  %vm504_vm8 = vc.u32 %v2118_v45, %v2111_v29 }
  0x4f   :  { %v671_v40 = vsel %vm670_vm7, %v669_v51, 0  ;;  %v506_v42 = vsel %vm504_vm8, %v505_v37, %v2112_v36  ;;  %v328_v61 = vadd.s32 3, %v324_v56  ;;  %v667_v6 = vor.u32 8388608, %v2075_v35 }
  0x50   :  { %v107_v53 = vxor.u32 2147483648, %v106_v43  ;;  %v310_v59 = vor.u32 %v309_v10, %v308_v47  ;;  %v313_v60 = vshll.u32 %v312_v55, 23  ;;  %v507_v58 = vadd.s32 %v506_v42, %v502_v52 }
  0x51   :  { %v673_v49 = vand.u32 31, %v671_v40  ;;  %vm119_vm9 = vcmp.eq.s32.totalorder %v2130_v46, 0  ;;  %vm122_vm10 = vcmp.eq.s32.totalorder %v2130_v46, 2  ;;  %vm224_vm11 = vcmp.eq.s32.totalorder %v2121_v54, 0 }
  0x52   :  { %v108_v57 = vsel %vm25_vm13, %v107_v53, %v106_v43  ;;  %v314_v2 = vor.u32 4788187, %v313_v60  ;;  %v317_v62 = vcvt.s32.f32 %v310_v59  ;;  %v508_v8 = vadd.s32 536870912, %v507_v58 }
  0x53   :  { %v111_v33 = vsel %vm2056_vm14, %v1954_v0, %v108_v57  ;;  %v674_v11 = vsub.s32 32, %v673_v49  ;;  %vm227_vm12 = vcmp.eq.s32.totalorder %v2121_v54, 2  ;;  %vm118_vm13 = vcmp.lt.s32.totalorder %v2130_v46, 2 }
  0x54   :  { %1841 = vcosq.f32 %v111_v33  ;;  %v315_v14 = vand.u32 2147483647, %v314_v2  ;;  %vm223_vm14 = vcmp.lt.s32.totalorder %v2121_v54, 2  ;;  %v2144_v23 = vand.u32 3, %v328_v61 }
  0x55   :  { %1843 = vsinq.f32 %v111_v33  ;;  %v2146_v15 = vand.u32 3, %v324_v56  ;;  %v2148_v35 = vshrl.u32 %v508_v8, 30  ;;  %v874_v16 = vand.u32 2139095040, %v2052_v13 }
  0x56   :  { %vm115_vm15 = vweird.f32 %v1954_v0  ;;  %v318_v17 = vmul.f32 %v317_v62, %v315_v14  ;;  %v2153_v18 = vadd.s32 %v2111_v29, %v2118_v45  ;;  %v2155_v19 = vshrl.u32 %v671_v40, 5 }
  0x57   :  { %v2157_v20 = vshll.u32 %v667_v6, 8  ;;  %v510_v7 = vshll.u32 %v2148_v35, 30  ;;  %v676_v21 = vshll.u32 %v1923_v26, %v673_v49  ;;  %v677_v22 = vshrl.u32 %v1924_v28, %v674_v11 }
  0x58   :  { %v679_v25 = vshll.u32 %v1924_v28, %v673_v49  ;;  %v319_v1 = vxor.u32 2147483648, %v318_v17  ;;  %v680_v27 = vshrl.u32 %v1925_v30, %v674_v11  ;;  %v682_v36 = vshll.u32 %v1925_v30, %v673_v49 }
  0x59   :  { %v683_v29 = vshrl.u32 %v1926_v32, %v674_v11  ;;  %vm449_vm1 = vcmp.lt.s32.totalorder %v1963_v4, 0  ;;  %v2167_v38 = vsub.s32 %v507_v58, %v510_v7  ;;  %v685_v39 = vshll.u32 %v1926_v32, %v673_v49 }
  0x5a   :  { %v686_v9 = vshrl.u32 %v1927_v34, %v674_v11  ;;  %v2171_v43 = vshrl.u32 %v874_v16, 23  ;;  %v320_v44 = vsel %vm237_vm0, %v319_v1, %v318_v17  ;;  %v675_v31 = vshrl.u32 %v1923_v26, %v674_v11 }
  0x5b   :  { %v688_v45 = vshll.u32 %v1927_v34, %v673_v49  ;;  %v689_v24 = vshrl.u32 %v1928_v41, %v674_v11  ;;  %v323_v50 = vsel %vm2095_vm5, %v1960_v3, %v320_v44  ;;  %v513_v51 = vsub.s32 0, %v2167_v38 }
  0x5c   :  { %v533_v53 = vsub.s32 4, %v2148_v35  ;;  %v678_v52 = vor.u32 %v677_v22, %v676_v21  ;;  %1845 = vcosq.f32 %v323_v50  ;;  %v681_v55 = vor.u32 %v680_v27, %v679_v25 }
  0x5d   :  { %v684_v56 = vor.u32 %v683_v29, %v682_v36  ;;  %1847 = vsinq.f32 %v323_v50  ;;  %v1752_v40 = vmin.u32 %v513_v51, %v2167_v38  ;;  %v687_v33 = vor.u32 %v686_v9, %v685_v39 }
  0x5e   :  { %v1842_v47 = vpop.eup %1841  ;;  %vm334_vm0 = vcmp.eq.s32.totalorder %v2144_v23, 2  ;;  %vm439_vm2 = vcmp.eq.s32.totalorder %v2146_v15, 2  ;;  %v690_v60 = vor.u32 %v689_v24, %v688_v45  ;;  %vm691_vm3 = vcmp.lt.s32.totalorder %v2155_v19, 1 }
  0x5f   :  { %v1844_v37 = vpop.eup %1843  ;;  %v123_v10 = vxor.u32 2147483648, %v1842_v47  ;;  %vm331_vm4 = vcmp.eq.s32.totalorder %v2144_v23, 0  ;;  %vm436_vm5 = vcmp.eq.s32.totalorder %v2146_v15, 0  ;;  %vm2199_vm6 = vcmp.le.f32.partialorder %v447_v48, 0.7853982 }
  0x60   :  { %v120_v57 = vxor.u32 2147483648, %v1844_v37  ;;  %v515_v49 = vclz %v1752_v40  ;;  %vm694_vm7 = vcmp.lt.s32.totalorder %v2155_v19, 4  ;;  %vm435_vm8 = vcmp.lt.s32.totalorder %v2146_v15, 2 }
  0x61   :  { %v124_v59 = vsel %vm122_vm10, %v123_v10, %v1844_v37  ;;  %v229_v5 = vsel %vm227_vm12, %v123_v10, %v1844_v37  ;;  %vm693_vm10 = vcmp.lt.s32.totalorder %v2155_v19, 3  ;;  %v696_v46 = vsel %vm694_vm7, %v684_v56, 2102212464 }
  0x62   :  { %v121_v42 = vsel %vm119_vm9, %v1842_v47, %v120_v57  ;;  %v226_v61 = vsel %vm224_vm11, %v1842_v47, %v120_v57  ;;  %vm692_vm9 = vcmp.lt.s32.totalorder %v2155_v19, 2  ;;  %vm327_vm11 = vweird.f32 %v1960_v3 }
  0x63   :  { %v125_v2 = vsel %vm118_vm13, %v121_v42, %v124_v59  ;;  %v230_v62 = vsel %vm223_vm14, %v226_v61, %v229_v5  ;;  %v1753_v8 = vadd.s32 4294967294, %v515_v49  ;;  %v534_v54 = vsel %vm449_vm1, %v533_v53, %v2148_v35 }
  0x64   :  { %v126_v48 = vsel %vm115_vm15, nan, %v125_v2  ;;  %v231_v6 = vsel %vm115_vm15, nan, %v230_v62  ;;  %v699_v11 = vsel %vm691_vm3, %v678_v52, %v681_v55  ;;  %v700_v14 = vsel %vm694_vm7, %v687_v33, 920167782 }
  0x65   :  { %128 = vst [vmem:[#allocation5 + $0x8] sm:$0xff] %v126_v48  ;;  %233 = vst [vmem:[#allocation5 + $0x10] sm:$0xff] %v231_v6  ;;  %v703_v16 = vsel %vm691_vm3, %v681_v55, %v684_v56  ;;  %vm1754_vm12 = vcmp.lt.s32.totalorder %v1753_v8, 0  ;;  %v695_v17 = vsel %vm691_vm3, %v675_v31, %v678_v52  ;;  %v701_v7 = vsel %vm693_vm10, %v684_v56, %v700_v14 }
  0x66   :  { %v704_v21 = vsel %vm694_vm7, %v690_v60, 1326507024  ;;  %v518_v35 = vsel %vm1754_vm12, 0, %v1753_v8  ;;  %v697_v22 = vsel %vm693_vm10, %v681_v55, %v696_v46  ;;  %v702_v25 = vsel %vm692_vm9, %v699_v11, %v701_v7  ;;  %v1846_v9 = vpop.eup %1845 }
  0x67   :  { %v705_v1 = vsel %vm693_vm10, %v687_v33, %v704_v21  ;;  %v519_v27 = vsub.s32 32, %v518_v35  ;;  %v520_v36 = vshll.u32 %v2167_v38, %v518_v35  ;;  %v523_v29 = vsub.s32 4294967266, %v518_v35  ;;  %v1848_v47 = vpop.eup %1847 }
  0x68   :  { %v706_v39 = vsel %vm692_vm9, %v703_v16, %v705_v1  ;;  %v2247_v45 = vmul.u32.u64.low %v2157_v20, %v702_v25  ;;  %v2248_v24 = vmul.u32.u64.high %v2157_v20, %v702_v25, %v2247_v45  ;;  %v335_v50 = vxor.u32 2147483648, %v1846_v9 }
  0x69   :  { %v2243_v44 = vmul.u32.u64.low %v2157_v20, %v706_v39  ;;  %v2244_v31 = vmul.u32.u64.high %v2157_v20, %v706_v39, %v2243_v44  ;;  %v521_v51 = vshrl.u32 %v2153_v18, %v519_v27  ;;  %v524_v53 = vadd.s32 127, %v523_v29 }
  0x6a   :  { %v698_v38 = vsel %vm692_vm9, %v695_v17, %v697_v22  ;;  %vm330_vm13 = vcmp.lt.s32.totalorder %v2144_v23, 2  ;;  %v332_v52 = vxor.u32 2147483648, %v1848_v47  ;;  %v536_v37 = vsel %vm2199_vm6, 0, %v534_v54 }
  0x6b   :  { %v1767_v10 = vadd.s32 4294967169, %v2171_v43  ;;  %v336_v55 = vsel %vm334_vm0, %v335_v50, %v1848_v47  ;;  %v441_v56 = vsel %vm439_vm2, %v335_v50, %v1848_v47  ;;  %v522_v57 = vor.u32 %v521_v51, %v520_v36 }
  0x6c   :  { %v525_v18 = vshll.u32 %v524_v53, 23  ;;  %v333_v19 = vsel %vm331_vm4, %v1846_v9, %v332_v52  ;;  %v438_v40 = vsel %vm436_vm5, %v1846_v9, %v332_v52  ;;  %v714_v33 = vmul.u32 %v2157_v20, %v698_v38 }
  0x6d   :  { %vm716_vm14 = vc.u32 %v2244_v31, %v2247_v45  ;;  %v337_v43 = vsel %vm330_vm13, %v333_v19, %v336_v55  ;;  %v442_v59 = vsel %vm435_vm8, %v438_v40, %v441_v56  ;;  %v529_v60 = vcvt.s32.f32 %v522_v57 }
  0x6e   :  { %v526_v5 = vor.u32 4788187, %v525_v18  ;;  %v338_v42 = vsel %vm327_vm11, nan, %v337_v43  ;;  %v443_v23 = vsel %vm327_vm11, nan, %v442_v59  ;;  %v717_v61 = vadd.s32 1, %v2248_v24 }
  0x6f   :  { %340 = vst [vmem:[#allocation5 + $0x18] sm:$0xff] %v338_v42  ;;  %445 = vst [vmem:[#allocation5 + $0x20] sm:$0xff] %v443_v23  ;;  %v881_v49 = vadd.s32 1, %v1767_v10  ;;  %v540_v2 = vadd.s32 3, %v536_v37  ;;  %v871_v15 = vand.u32 2147483647, %v2052_v13  ;;  %v715_v52 = vadd.s32 %v2247_v45, %v2244_v31 }
  0x70   :  { %v527_v20 = vand.u32 2147483647, %v526_v5  ;;  %v718_v62 = vsel %vm716_vm14, %v717_v61, %v2248_v24  ;;  %v2279_v48 = vmul.f32 32.0, %v1954_v0  ;;  %v2284_v17 = vand.u32 3, %v536_v37 }
  0x71   :  { %v719_v8 = vadd.s32 %v718_v62, %v714_v33  ;;  %vm882_vm15 = vcmp.gt.s32.totalorder %v881_v49, 0  ;;  %v2282_v16 = vand.u32 3, %v540_v2  ;;  %v878_v7 = vand.u32 8388607, %v871_v15 }
  0x72   :  { %v530_v6 = vmul.f32 %v529_v60, %v527_v20  ;;  %v883_v46 = vsel %vm882_vm15, %v881_v49, 0  ;;  %v1083_v3 = vand.u32 2147483647, %v2279_v48  ;;  %v1086_v25 = vand.u32 2139095040, %v2279_v48 }
  0x73   :  { %v720_v11 = vadd.s32 536870912, %v719_v8  ;;  %v885_v14 = vand.u32 31, %v883_v46  ;;  %v879_v51 = vor.u32 8388608, %v878_v7  ;;  %v884_v53 = vshrl.u32 %v883_v46, 5 }
  0x74   :  { %v531_v54 = vxor.u32 2147483648, %v530_v6  ;;  %v1090_v29 = vand.u32 8388607, %v1083_v3  ;;  %vm543_vm0 = vcmp.eq.s32.totalorder %v2282_v16, 0  ;;  %vm648_vm2 = vcmp.eq.s32.totalorder %v2284_v17, 0 }
  0x75   :  { %v2290_v35 = vshrl.u32 %v720_v11, 30  ;;  %v886_v22 = vsub.s32 32, %v885_v14  ;;  %v888_v27 = vshll.u32 %v1923_v26, %v885_v14  ;;  %v891_v36 = vshll.u32 %v1924_v28, %v885_v14 }
  0x76   :  { %v532_v21 = vsel %vm449_vm1, %v531_v54, %v530_v6  ;;  %v894_v9 = vshll.u32 %v1925_v30, %v885_v14  ;;  %v897_v44 = vshll.u32 %v1926_v32, %v885_v14  ;;  %vm546_vm1 = vcmp.eq.s32.totalorder %v2282_v16, 2 }
  0x77   :  { %v535_v1 = vsel %vm2199_vm6, %v1963_v4, %v532_v21  ;;  %v722_v39 = vshll.u32 %v2290_v35, 30  ;;  %v889_v24 = vshrl.u32 %v1924_v28, %v886_v22  ;;  %v892_v58 = vshrl.u32 %v1925_v30, %v886_v22 }
  0x78   :  { %1849 = vcosq.f32 %v535_v1  ;;  %v895_v47 = vshrl.u32 %v1926_v32, %v886_v22  ;;  %v898_v38 = vshrl.u32 %v1927_v34, %v886_v22  ;;  %vm651_vm3 = vcmp.eq.s32.totalorder %v2284_v17, 2 }
  0x79   :  { %1851 = vsinq.f32 %v535_v1  ;;  %v2307_v50 = vsub.s32 %v719_v8, %v722_v39  ;;  %v900_v37 = vshll.u32 %v1927_v34, %v885_v14  ;;  %v1087_v10 = vshrl.u32 %v1086_v25, 23 }
  0x7a   :  { %vm542_vm4 = vcmp.lt.s32.totalorder %v2282_v16, 2  ;;  %vm647_vm5 = vcmp.lt.s32.totalorder %v2284_v17, 2  ;;  %v887_v56 = vshrl.u32 %v1923_v26, %v886_v22  ;;  %v890_v57 = vor.u32 %v889_v24, %v888_v27 }
  0x7b   :  { %v725_v55 = vsub.s32 0, %v2307_v50  ;;  %v1091_v18 = vor.u32 8388608, %v1090_v29  ;;  %vm539_vm6 = vweird.f32 %v1963_v4  ;;  %v893_v19 = vor.u32 %v892_v58, %v891_v36 }
  0x7c   :  { %v896_v40 = vor.u32 %v895_v47, %v894_v9  ;;  %v899_v33 = vor.u32 %v898_v38, %v897_v44  ;;  %v901_v31 = vshrl.u32 %v1928_v41, %v886_v22  ;;  %vm903_vm7 = vcmp.lt.s32.totalorder %v884_v53, 1 }
  0x7d   :  { %v1760_v45 = vmin.u32 %v725_v55, %v2307_v50  ;;  %v2323_v43 = vshll.u32 %v879_v51, 8  ;;  %v2326_v59 = vmul.f32 64.0, %v1954_v0  ;;  %vm905_vm8 = vcmp.lt.s32.totalorder %v884_v53, 3 }
  0x7e   :  { %v902_v5 = vor.u32 %v901_v31, %v900_v37  ;;  %vm906_vm9 = vcmp.lt.s32.totalorder %v884_v53, 4  ;;  %v1775_v60 = vadd.s32 4294967169, %v1087_v10  ;;  %vm904_vm10 = vcmp.lt.s32.totalorder %v884_v53, 2 }
  0x7f   :  { %v727_v42 = vclz %v1760_v45  ;;  %v907_v23 = vsel %vm903_vm7, %v887_v56, %v890_v57  ;;  %v2328_v61 = vshll.u32 %v1091_v18, 8  ;;  %v908_v20 = vsel %vm906_vm9, %v896_v40, 2102212464 }
  0x80   :  { %v911_v49 = vsel %vm903_vm7, %v890_v57, %v893_v19  ;;  %v912_v2 = vsel %vm906_vm9, %v899_v33, 920167782  ;;  %v915_v62 = vsel %vm903_vm7, %v893_v19, %v896_v40  ;;  %vm661_vm11 = vcmp.lt.s32.totalorder %v2046_v63, 0 }
  0x81   :  { %v1761_v8 = vadd.s32 4294967294, %v727_v42  ;;  %v909_v0 = vsel %vm905_vm8, %v893_v19, %v908_v20  ;;  %v913_v46 = vsel %vm905_vm8, %v896_v40, %v912_v2  ;;  %v916_v54 = vsel %vm906_vm9, %v902_v5, 1326507024 }
  0x82   :  { %v1850_v6 = vpop.eup %1849  ;;  %v745_v7 = vsub.s32 4, %v2290_v35  ;;  %v910_v21 = vsel %vm904_vm10, %v907_v23, %v909_v0  ;;  %v917_v22 = vsel %vm905_vm8, %v899_v33, %v916_v54  ;;  %v914_v1 = vsel %vm904_vm10, %v911_v49, %v913_v46 }
  0x83   :  { %v1852_v11 = vpop.eup %1851  ;;  %v547_v14 = vxor.u32 2147483648, %v1850_v6  ;;  %vm1762_vm12 = vcmp.lt.s32.totalorder %v1761_v8, 0  ;;  %v918_v27 = vsel %vm904_vm10, %v915_v62, %v917_v22  ;;  %v1093_v9 = vadd.s32 1, %v1775_v60 }
  0x84   :  { %v544_v25 = vxor.u32 2147483648, %v1852_v11  ;;  %v730_v39 = vsel %vm1762_vm12, 0, %v1761_v8  ;;  %vm2363_vm14 = vcmp.le.f32.partialorder %v659_v12, 0.7853982  ;;  %v746_v31 = vsel %vm661_vm11, %v745_v7, %v2290_v35 }
  0x85   :  { %v548_v36 = vsel %vm546_vm1, %v547_v14, %v1852_v11  ;;  %v653_v29 = vsel %vm651_vm3, %v547_v14, %v1852_v11  ;;  %v731_v58 = vsub.s32 32, %v730_v39  ;;  %v732_v47 = vshll.u32 %v2307_v50, %v730_v39 }
  0x86   :  { %v545_v44 = vsel %vm543_vm0, %v1850_v6, %v544_v25  ;;  %v650_v24 = vsel %vm648_vm2, %v1850_v6, %v544_v25  ;;  %v735_v38 = vsub.s32 4294967266, %v730_v39  ;;  %vm1094_vm13 = vcmp.gt.s32.totalorder %v1093_v9, 0 }
  0x87   :  { %v549_v51 = vsel %vm542_vm4, %v545_v44, %v548_v36  ;;  %v654_v53 = vsel %vm647_vm5, %v650_v24, %v653_v29  ;;  %v733_v55 = vshrl.u32 %v715_v52, %v731_v58  ;;  %v1095_v56 = vsel %vm1094_vm13, %v1093_v9, 0 }
  0x88   :  { %v550_v37 = vsel %vm539_vm6, nan, %v549_v51  ;;  %v655_v10 = vsel %vm539_vm6, nan, %v654_v53  ;;  %v736_v57 = vadd.s32 127, %v735_v38  ;;  %v2359_v18 = vshrl.u32 %v1095_v56, 5 }
  0x89   :  { %552 = vst [vmem:[#allocation5 + $0x28] sm:$0xff] %v550_v37  ;;  %657 = vst [vmem:[#allocation5 + $0x30] sm:$0xff] %v655_v10  ;;  %v2356_v50 = vmul.u32.u64.low %v2323_v43, %v918_v27  ;;  %v2357_v16 = vmul.u32.u64.high %v2323_v43, %v918_v27, %v2356_v50  ;;  %v734_v19 = vor.u32 %v733_v55, %v732_v47  ;;  %v1097_v40 = vand.u32 31, %v1095_v56 }
  0x8a   :  { %v2368_v4 = vmul.u32.u64.low %v2323_v43, %v914_v1  ;;  %v2369_v52 = vmul.u32.u64.high %v2323_v43, %v914_v1, %v2368_v4  ;;  %v737_v33 = vshll.u32 %v736_v57, 23  ;;  %v926_v45 = vmul.u32 %v2323_v43, %v910_v21 }
  0x8b   :  { %vm1115_vm15 = vcmp.lt.s32.totalorder %v2359_v18, 1  ;;  %v1098_v12 = vsub.s32 32, %v1097_v40  ;;  %v1100_v5 = vshll.u32 %v1923_v26, %v1097_v40  ;;  %v1103_v60 = vshll.u32 %v1924_v28, %v1097_v40 }
  0x8c   :  { %vm1117_vm1 = vcmp.lt.s32.totalorder %v2359_v18, 3  ;;  %v738_v42 = vor.u32 4788187, %v737_v33  ;;  %v741_v23 = vcvt.s32.f32 %v734_v19  ;;  %vm928_vm0 = vc.u32 %v2357_v16, %v2368_v4 }
  0x8d   :  { %v1106_v20 = vshll.u32 %v1925_v30, %v1097_v40  ;;  %v929_v35 = vadd.s32 1, %v2369_v52  ;;  %v1099_v43 = vshrl.u32 %v1923_v26, %v1098_v12  ;;  %v1101_v49 = vshrl.u32 %v1924_v28, %v1098_v12 }
  0x8e   :  { %v1104_v2 = vshrl.u32 %v1925_v30, %v1098_v12  ;;  %v739_v62 = vand.u32 2147483647, %v738_v42  ;;  %v1107_v6 = vshrl.u32 %v1926_v32, %v1098_v12  ;;  %v1109_v8 = vshll.u32 %v1926_v32, %v1097_v40 }
  0x8f   :  { %v1110_v0 = vshrl.u32 %v1927_v34, %v1098_v12  ;;  %v930_v46 = vsel %vm928_vm0, %v929_v35, %v2369_v52  ;;  %v1102_v54 = vor.u32 %v1101_v49, %v1100_v5  ;;  %v1112_v14 = vshll.u32 %v1927_v34, %v1097_v40 }
  0x90   :  { %v1105_v11 = vor.u32 %v1104_v2, %v1103_v60  ;;  %v742_v7 = vmul.f32 %v741_v23, %v739_v62  ;;  %v931_v21 = vadd.s32 %v930_v46, %v926_v45  ;;  %v1108_v22 = vor.u32 %v1107_v6, %v1106_v20 }
  0x91   :  { %v1111_v25 = vor.u32 %v1110_v0, %v1109_v8  ;;  %v1113_v1 = vshrl.u32 %v1928_v41, %v1098_v12  ;;  %vm1116_vm2 = vcmp.lt.s32.totalorder %v2359_v18, 2  ;;  %vm1118_vm3 = vcmp.lt.s32.totalorder %v2359_v18, 4 }
  0x92   :  { %v1123_v27 = vsel %vm1115_vm15, %v1102_v54, %v1105_v11  ;;  %v743_v36 = vxor.u32 2147483648, %v742_v7  ;;  %v748_v29 = vsel %vm2363_vm14, 0, %v746_v31  ;;  %v932_v39 = vadd.s32 536870912, %v931_v21 }
  0x93   :  { %v1124_v9 = vsel %vm1118_vm3, %v1111_v25, 920167782  ;;  %v1114_v44 = vor.u32 %v1113_v1, %v1112_v14  ;;  %v1119_v24 = vsel %vm1115_vm15, %v1099_v43, %v1102_v54  ;;  %v1120_v58 = vsel %vm1118_vm3, %v1108_v22, 2102212464 }
  0x94   :  { %v1125_v47 = vsel %vm1117_vm1, %v1108_v22, %v1124_v9  ;;  %v744_v51 = vsel %vm661_vm11, %v743_v36, %v742_v7  ;;  %v933_v53 = vshrl.u32 %v932_v39, 30  ;;  %v1127_v37 = vsel %vm1115_vm15, %v1105_v11, %v1108_v22 }
  0x95   :  { %v1126_v38 = vsel %vm1116_vm2, %v1123_v27, %v1125_v47  ;;  %v747_v10 = vsel %vm2363_vm14, %v2046_v63, %v744_v51  ;;  %v1128_v55 = vsel %vm1118_vm3, %v1114_v44, 1326507024  ;;  %v1121_v19 = vsel %vm1117_vm1, %v1105_v11, %v1120_v58 }
  0x96   :  { %v2413_v56 = vmul.u32.u64.low %v2328_v61, %v1126_v38  ;;  %v2414_v57 = vmul.u32.u64.high %v2328_v61, %v1126_v38, %v2413_v56  ;;  %1853 = vcosq.f32 %v747_v10  ;;  %v934_v50 = vshll.u32 %v933_v53, 30 }
  0x97   :  { %v1129_v52 = vsel %vm1117_vm1, %v1111_v25, %v1128_v55  ;;  %1855 = vsinq.f32 %v747_v10  ;;  %v752_v40 = vadd.s32 3, %v748_v29  ;;  %v1122_v12 = vsel %vm1116_vm2, %v1119_v24, %v1121_v19 }
  0x98   :  { %v1130_v17 = vsel %vm1116_vm2, %v1127_v37, %v1129_v52  ;;  %v935_v33 = vsub.s32 %v931_v21, %v934_v50  ;;  %v1298_v5 = vand.u32 2139095040, %v2326_v59  ;;  %v858_v60 = vand.u32 3, %v748_v29 }
  0x99   :  { %v2424_v31 = vmul.u32.u64.low %v2328_v61, %v1130_v17  ;;  %v2425_v45 = vmul.u32.u64.high %v2328_v61, %v1130_v17, %v2424_v31  ;;  %v957_v23 = vsub.s32 4, %v933_v53  ;;  %v753_v20 = vand.u32 3, %v752_v40 }
  0x9a   :  { %v937_v42 = vsub.s32 0, %v935_v33  ;;  %v1141_v35 = vadd.s32 1, %v2414_v57  ;;  %v1299_v43 = vshrl.u32 %v1298_v5, 23  ;;  %vm751_vm4 = vweird.f32 %v2046_v63 }
  0x9b   :  { %vm2434_vm5 = vcmp.le.f32.partialorder %v871_v15, 0.7853982  ;;  %v1138_v18 = vmul.u32 %v2328_v61, %v1122_v12  ;;  %vm873_vm6 = vcmp.lt.s32.totalorder %v2052_v13, 0  ;;  %vm1140_vm7 = vc.u32 %v2425_v45, %v2413_v56 }
  0x9c   :  { %v1768_v2 = vmin.u32 %v937_v42, %v935_v33  ;;  %v1295_v62 = vand.u32 2147483647, %v2326_v59  ;;  %v1783_v6 = vadd.s32 4294967169, %v1299_v43  ;;  %vm859_vm8 = vcmp.lt.s32.totalorder %v858_v60, 2 }
  0x9d   :  { %vm860_vm9 = vcmp.eq.s32.totalorder %v858_v60, 0  ;;  %v958_v15 = vsel %vm873_vm6, %v957_v23, %v933_v53  ;;  %vm754_vm10 = vcmp.lt.s32.totalorder %v753_v20, 2  ;;  %vm863_vm11 = vcmp.eq.s32.totalorder %v858_v60, 2  ;;  %v1873_v60 = vld [vmem:[#allocation5] sm:$0xff] }
  0x9e   :  { %v939_v8 = vclz %v1768_v2  ;;  %v1142_v0 = vsel %vm1140_vm7, %v1141_v35, %v2414_v57  ;;  %v1305_v46 = vadd.s32 1, %v1783_v6  ;;  %vm755_vm12 = vcmp.eq.s32.totalorder %v753_v20, 0 }
  0x9f   :  { %vm758_vm13 = vcmp.eq.s32.totalorder %v753_v20, 2  ;;  %v1143_v11 = vadd.s32 %v1142_v0, %v1138_v18  ;;  %v927_v21 = vadd.s32 %v2368_v4, %v2357_v16  ;;  %v960_v22 = vsel %vm2434_vm5, 0, %v958_v15 }
  0xa0   :  { %v1854_v61 = vpop.eup %1853  ;;  %v1769_v54 = vadd.s32 4294967294, %v939_v8  ;;  %vm1306_vm14 = vcmp.gt.s32.totalorder %v1305_v46, 0  ;;  %v1302_v27 = vand.u32 8388607, %v1295_v62  ;;  %v2464_v17 = vadd.s32 3, %v960_v22 }
  0xa1   :  { %v1856_v14 = vpop.eup %1855  ;;  %v759_v7 = vxor.u32 2147483648, %v1854_v61  ;;  %v1144_v1 = vadd.s32 536870912, %v1143_v11  ;;  %v1307_v9 = vsel %vm1306_vm14, %v1305_v46, 0  ;;  %v2472_v42 = vmul.f32 128.0, %v1873_v60 }
  0xa2   :  { %v756_v25 = vxor.u32 2147483648, %v1856_v14  ;;  %vm1770_vm15 = vcmp.lt.s32.totalorder %v1769_v54, 0  ;;  %v1309_v55 = vand.u32 31, %v1307_v9  ;;  %v1303_v31 = vor.u32 8388608, %v1302_v27 }
  0xa3   :  { %v760_v36 = vsel %vm758_vm13, %v759_v7, %v1856_v14  ;;  %v865_v29 = vsel %vm863_vm11, %v759_v7, %v1856_v14  ;;  %v942_v39 = vsel %vm1770_vm15, 0, %v1769_v54  ;;  %v2457_v53 = vshrl.u32 %v1144_v1, 30 }
  0xa4   :  { %v757_v44 = vsel %vm755_vm12, %v1854_v61, %v756_v25  ;;  %v862_v24 = vsel %vm860_vm9, %v1854_v61, %v756_v25  ;;  %v943_v16 = vsub.s32 32, %v942_v39  ;;  %v944_v4 = vshll.u32 %v935_v33, %v942_v39 }
  0xa5   :  { %v761_v58 = vsel %vm754_vm10, %v757_v44, %v760_v36  ;;  %v866_v47 = vsel %vm859_vm8, %v862_v24, %v865_v29  ;;  %v947_v51 = vsub.s32 4294967266, %v942_v39  ;;  %v1146_v50 = vshll.u32 %v2457_v53, 30 }
  0xa6   :  { %v762_v38 = vsel %vm751_vm4, nan, %v761_v58  ;;  %v867_v37 = vsel %vm751_vm4, nan, %v866_v47  ;;  %v945_v10 = vshrl.u32 %v927_v21, %v943_v16  ;;  %v1310_v52 = vsub.s32 32, %v1309_v55 }
  0xa7   :  { %764 = vst [vmem:[#allocation5 + $0x38] sm:$0xff] %v762_v38  ;;  %869 = vst [vmem:[#allocation5 + $0x40] sm:$0xff] %v867_v37  ;;  %v948_v57 = vadd.s32 127, %v947_v51  ;;  %v2466_v33 = vsub.s32 %v1143_v11, %v1146_v50  ;;  %v2468_v12 = vshrl.u32 %v1307_v9, 5  ;;  %v1312_v63 = vshll.u32 %v1923_v26, %v1309_v55 }
  0xa8   :  { %v946_v19 = vor.u32 %v945_v10, %v944_v4  ;;  %v1315_v5 = vshll.u32 %v1924_v28, %v1309_v55  ;;  %v1313_v43 = vshrl.u32 %v1924_v28, %v1310_v52  ;;  %v2476_v2 = vand.u32 3, %v960_v22 }
  0xa9   :  { %v949_v40 = vshll.u32 %v948_v57, 23  ;;  %v1149_v35 = vsub.s32 0, %v2466_v33  ;;  %v1316_v18 = vshrl.u32 %v1925_v30, %v1310_v52  ;;  %v1318_v6 = vshll.u32 %v1925_v30, %v1309_v55 }
  0xaa   :  { %v953_v20 = vcvt.s32.f32 %v946_v19  ;;  %v1319_v8 = vshrl.u32 %v1926_v32, %v1310_v52  ;;  %v1139_v0 = vadd.s32 %v2413_v56, %v2425_v45  ;;  %v2484_v61 = vshll.u32 %v1303_v31, 8 }
  0xab   :  { %v950_v23 = vor.u32 4788187, %v949_v40  ;;  %v1776_v46 = vmin.u32 %v1149_v35, %v2466_v33  ;;  %v1311_v54 = vshrl.u32 %v1923_v26, %v1310_v52  ;;  %v1321_v11 = vshll.u32 %v1926_v32, %v1309_v55 }
  0xac   :  { %vm1327_vm1 = vcmp.lt.s32.totalorder %v2468_v12, 1  ;;  %v1510_v14 = vand.u32 2139095040, %v2472_v42  ;;  %v1314_v22 = vor.u32 %v1313_v43, %v1312_v63  ;;  %v1317_v25 = vor.u32 %v1316_v18, %v1315_v5 }
  0xad   :  { %v951_v15 = vand.u32 2147483647, %v950_v23  ;;  %v1151_v21 = vclz %v1776_v46  ;;  %v1320_v1 = vor.u32 %v1319_v8, %v1318_v6  ;;  %v1322_v27 = vshrl.u32 %v1927_v34, %v1310_v52 }
  0xae   :  { %v1324_v56 = vshll.u32 %v1927_v34, %v1309_v55  ;;  %v1325_v45 = vshrl.u32 %v1928_v41, %v1310_v52  ;;  %vm1328_vm0 = vcmp.lt.s32.totalorder %v2468_v12, 2  ;;  %vm1329_vm2 = vcmp.lt.s32.totalorder %v2468_v12, 3 }
  0xaf   :  { %v954_v7 = vmul.f32 %v953_v20, %v951_v15  ;;  %v1777_v29 = vadd.s32 4294967294, %v1151_v21  ;;  %v1323_v39 = vor.u32 %v1322_v27, %v1321_v11  ;;  %vm1330_vm3 = vcmp.lt.s32.totalorder %v2468_v12, 4 }
  0xb0   :  { %v1326_v9 = vor.u32 %v1325_v45, %v1324_v56  ;;  %v1331_v44 = vsel %vm1327_vm1, %v1311_v54, %v1314_v22  ;;  %v1332_v16 = vsel %vm1330_vm3, %v1320_v1, 2102212464  ;;  %v1335_v4 = vsel %vm1327_vm1, %v1314_v22, %v1317_v25 }
  0xb1   :  { %v955_v36 = vxor.u32 2147483648, %v954_v7  ;;  %vm1778_vm4 = vcmp.lt.s32.totalorder %v1777_v29, 0  ;;  %v1333_v51 = vsel %vm1329_vm2, %v1317_v25, %v1332_v16  ;;  %v1336_v38 = vsel %vm1330_vm3, %v1323_v39, 920167782 }
  0xb2   :  { %v1154_v47 = vsel %vm1778_vm4, 0, %v1777_v29  ;;  %v1169_v57 = vsub.s32 4, %v2457_v53  ;;  %v1337_v50 = vsel %vm1329_vm2, %v1320_v1, %v1336_v38  ;;  %v1339_v49 = vsel %vm1327_vm1, %v1317_v25, %v1320_v1 }
  0xb3   :  { %v956_v24 = vsel %vm873_vm6, %v955_v36, %v954_v7  ;;  %v1155_v37 = vsub.s32 32, %v1154_v47  ;;  %v1156_v10 = vshll.u32 %v2466_v33, %v1154_v47  ;;  %v1159_v55 = vsub.s32 4294967266, %v1154_v47 }
  0xb4   :  { %v959_v58 = vsel %vm2434_vm5, %v2052_v13, %v956_v24  ;;  %v1338_v40 = vsel %vm1328_vm0, %v1335_v4, %v1337_v50  ;;  %v1340_v31 = vsel %vm1330_vm3, %v1326_v9, 1326507024  ;;  %v1334_v33 = vsel %vm1328_vm0, %v1331_v44, %v1333_v51 }
  0xb5   :  { %1857 = vcosq.f32 %v959_v58  ;;  %v1157_v19 = vshrl.u32 %v1139_v0, %v1155_v37  ;;  %v1160_v52 = vadd.s32 127, %v1159_v55  ;;  %v1341_v63 = vsel %vm1329_vm2, %v1323_v39, %v1340_v31 }
  0xb6   :  { %1859 = vsinq.f32 %v959_v58  ;;  %v2526_v5 = vmul.u32.u64.low %v2484_v61, %v1338_v40  ;;  %v2527_v60 = vmul.u32.u64.high %v2484_v61, %v1338_v40, %v2526_v5  ;;  %v1342_v35 = vsel %vm1328_vm0, %v1339_v49, %v1341_v63 }
  0xb7   :  { %v1158_v23 = vor.u32 %v1157_v19, %v1156_v10  ;;  %v1161_v20 = vshll.u32 %v1160_v52, 23  ;;  %v1511_v43 = vshrl.u32 %v1510_v14, 23  ;;  %vm963_vm5 = vweird.f32 %v2052_v13 }
  0xb8   :  { %v965_v18 = vand.u32 3, %v2464_v17  ;;  %vm2536_vm6 = vcmp.le.f32.partialorder %v1083_v3, 0.7853982  ;;  %v2541_v8 = vmul.u32.u64.low %v2484_v61, %v1342_v35  ;;  %v2542_v15 = vmul.u32.u64.high %v2484_v61, %v1342_v35, %v2541_v8 }
  0xb9   :  { %vm1085_vm7 = vcmp.lt.s32.totalorder %v2279_v48, 0  ;;  %v1162_v0 = vor.u32 4788187, %v1161_v20  ;;  %v1165_v12 = vcvt.s32.f32 %v1158_v23  ;;  %v1791_v46 = vadd.s32 4294967169, %v1511_v43 }
  0xba   :  { %vm1071_vm8 = vcmp.lt.s32.totalorder %v2476_v2, 2  ;;  %v1170_v17 = vsel %vm1085_vm7, %v1169_v57, %v2457_v53  ;;  %v1350_v3 = vmul.u32 %v2484_v61, %v1334_v33  ;;  %v1353_v54 = vadd.s32 1, %v2527_v60 }
  0xbb   :  { %vm1072_vm9 = vcmp.eq.s32.totalorder %v2476_v2, 0  ;;  %v1163_v11 = vand.u32 2147483647, %v1162_v0  ;;  %v1507_v14 = vand.u32 2147483647, %v2472_v42  ;;  %v1517_v7 = vadd.s32 1, %v1791_v46 }
  0xbc   :  { %vm966_vm10 = vcmp.lt.s32.totalorder %v965_v18, 2  ;;  %vm970_vm11 = vcmp.eq.s32.totalorder %v965_v18, 2  ;;  %vm1075_vm12 = vcmp.eq.s32.totalorder %v2476_v2, 2  ;;  %vm1352_vm13 = vc.u32 %v2542_v15, %v2526_v5 }
  0xbd   :  { %v1166_v22 = vmul.f32 %v1165_v12, %v1163_v11  ;;  %v1172_v53 = vsel %vm2536_vm6, 0, %v1170_v17  ;;  %v1354_v61 = vsel %vm1352_vm13, %v1353_v54, %v2527_v60  ;;  %vm1518_vm14 = vcmp.gt.s32.totalorder %v1517_v7, 0 }
  0xbe   :  { %vm967_vm15 = vcmp.eq.s32.totalorder %v965_v18, 0  ;;  %v1355_v27 = vadd.s32 %v1354_v61, %v1350_v3  ;;  %v1519_v56 = vsel %vm1518_vm14, %v1517_v7, 0  ;;  %v1514_v29 = vand.u32 8388607, %v1507_v14 }
  0xbf   :  { %v1858_v21 = vpop.eup %1857  ;;  %v1167_v36 = vxor.u32 2147483648, %v1166_v22  ;;  %v1521_v39 = vand.u32 31, %v1519_v56  ;;  %v1176_v24 = vadd.s32 3, %v1172_v53  ;;  %v2580_v49 = vand.u32 3, %v1172_v53 }
  0xc0   :  { %v1860_v25 = vpop.eup %1859  ;;  %v971_v1 = vxor.u32 2147483648, %v1858_v21  ;;  %v1356_v16 = vadd.s32 536870912, %v1355_v27  ;;  %v2590_v60 = vshrl.u32 %v1519_v56, 5  ;;  %v1515_v35 = vor.u32 8388608, %v1514_v29 }
  0xc1   :  { %v968_v45 = vxor.u32 2147483648, %v1860_v25  ;;  %v1168_v47 = vsel %vm1085_vm7, %v1167_v36, %v1166_v22  ;;  %v1522_v51 = vsub.s32 32, %v1521_v39  ;;  %v1177_v2 = vand.u32 3, %v1176_v24 }
  0xc2   :  { %v972_v9 = vsel %vm970_vm11, %v971_v1, %v1860_v25  ;;  %v1077_v44 = vsel %vm1075_vm12, %v971_v1, %v1860_v25  ;;  %v1171_v10 = vsel %vm2536_vm6, %v2279_v48, %v1168_v47  ;;  %v2574_v55 = vshrl.u32 %v1356_v16, 30 }
  0xc3   :  { %v969_v4 = vsel %vm967_vm15, %v1858_v21, %v968_v45  ;;  %v1074_v58 = vsel %vm1072_vm9, %v1858_v21, %v968_v45  ;;  %1861 = vcosq.f32 %v1171_v10  ;;  %v1524_v52 = vshll.u32 %v1923_v26, %v1521_v39 }
  0xc4   :  { %v973_v38 = vsel %vm966_vm10, %v969_v4, %v972_v9  ;;  %v1078_v37 = vsel %vm1071_vm8, %v1074_v58, %v1077_v44  ;;  %1863 = vsinq.f32 %v1171_v10  ;;  %v1358_v19 = vshll.u32 %v2574_v55, 30 }
  0xc5   :  { %v974_v57 = vsel %vm963_vm5, nan, %v973_v38  ;;  %v1079_v50 = vsel %vm963_vm5, nan, %v1078_v37  ;;  %v1525_v40 = vshrl.u32 %v1924_v28, %v1522_v51  ;;  %v1527_v31 = vshll.u32 %v1924_v28, %v1521_v39 }
  0xc6   :  { %976 = vst [vmem:[#allocation5 + $0x48] sm:$0xff] %v974_v57  ;;  %1081 = vst [vmem:[#allocation5 + $0x50] sm:$0xff] %v1079_v50  ;;  %v1528_v33 = vshrl.u32 %v1925_v30, %v1522_v51  ;;  %v1530_v13 = vshll.u32 %v1925_v30, %v1521_v39  ;;  %v2588_v63 = vsub.s32 %v1355_v27, %v1358_v19  ;;  %vm1283_vm1 = vcmp.lt.s32.totalorder %v2580_v49, 2 }
  0xc7   :  { %v1531_v23 = vshrl.u32 %v1926_v32, %v1522_v51  ;;  %v1533_v20 = vshll.u32 %v1926_v32, %v1521_v39  ;;  %vm1284_vm0 = vcmp.eq.s32.totalorder %v2580_v49, 0  ;;  %v1534_v43 = vshrl.u32 %v1927_v34, %v1522_v51 }
  0xc8   :  { %vm1175_vm2 = vweird.f32 %v2279_v48  ;;  %vm1287_vm3 = vcmp.eq.s32.totalorder %v2580_v49, 2  ;;  %v1361_v28 = vsub.s32 0, %v2588_v63  ;;  %v1523_v30 = vshrl.u32 %v1923_v26, %v1522_v51 }
  0xc9   :  { %v1526_v18 = vor.u32 %v1525_v40, %v1524_v52  ;;  %v1529_v6 = vor.u32 %v1528_v33, %v1527_v31  ;;  %v1532_v8 = vor.u32 %v1531_v23, %v1530_v13  ;;  %v1536_v32 = vshll.u32 %v1927_v34, %v1521_v39 }
  0xca   :  { %v1537_v0 = vshrl.u32 %v1928_v41, %v1522_v51  ;;  %vm1178_vm4 = vcmp.lt.s32.totalorder %v1177_v2, 2  ;;  %v1784_v12 = vmin.u32 %v1361_v28, %v2588_v63  ;;  %v1535_v46 = vor.u32 %v1534_v43, %v1533_v20 }
  0xcb   :  { %vm1539_vm5 = vcmp.lt.s32.totalorder %v2590_v60, 1  ;;  %vm1179_vm6 = vcmp.eq.s32.totalorder %v1177_v2, 0  ;;  %vm1182_vm7 = vcmp.eq.s32.totalorder %v1177_v2, 2  ;;  %v1555_v3 = vshll.u32 %v1515_v35, 8 }
  0xcc   :  { %v1538_v17 = vor.u32 %v1537_v0, %v1536_v32  ;;  %v1351_v26 = vadd.s32 %v2526_v5, %v2542_v15  ;;  %v1363_v54 = vclz %v1784_v12  ;;  %vm1540_vm8 = vcmp.lt.s32.totalorder %v2590_v60, 2 }
  0xcd   :  { %vm1541_vm9 = vcmp.lt.s32.totalorder %v2590_v60, 3  ;;  %v1862_v34 = vpop.eup %1861  ;;  %vm1542_vm10 = vcmp.lt.s32.totalorder %v2590_v60, 4  ;;  %v1543_v41 = vsel %vm1539_vm5, %v1523_v30, %v1526_v18  ;;  %v1547_v11 = vsel %vm1539_vm5, %v1526_v18, %v1529_v6 }
  0xce   :  { %v1551_v7 = vsel %vm1539_vm5, %v1529_v6, %v1532_v8  ;;  %v1864_v21 = vpop.eup %1863  ;;  %v1183_v22 = vxor.u32 2147483648, %v1862_v34  ;;  %v1785_v53 = vadd.s32 4294967294, %v1363_v54  ;;  %v1544_v61 = vsel %vm1542_vm10, %v1532_v8, 2102212464 }
  0xcf   :  { %v1548_v25 = vsel %vm1542_vm10, %v1535_v46, 920167782  ;;  %v1180_v1 = vxor.u32 2147483648, %v1864_v21  ;;  %v1545_v5 = vsel %vm1541_vm9, %v1529_v6, %v1544_v61  ;;  %v1552_v27 = vsel %vm1542_vm10, %v1538_v17, 1326507024 }
  0xd0   :  { %v1549_v15 = vsel %vm1541_vm9, %v1532_v8, %v1548_v25  ;;  %v1184_v56 = vsel %vm1182_vm7, %v1183_v22, %v1864_v21  ;;  %v1289_v45 = vsel %vm1287_vm3, %v1183_v22, %v1864_v21  ;;  %vm1786_vm11 = vcmp.lt.s32.totalorder %v1785_v53, 0 }
  0xd1   :  { %v1546_v36 = vsel %vm1540_vm8, %v1543_v41, %v1545_v5  ;;  %v1181_v29 = vsel %vm1179_vm6, %v1862_v34, %v1180_v1  ;;  %v1286_v39 = vsel %vm1284_vm0, %v1862_v34, %v1180_v1  ;;  %v1366_v9 = vsel %vm1786_vm11, 0, %v1785_v53 }
  0xd2   :  { %v1550_v44 = vsel %vm1540_vm8, %v1547_v11, %v1549_v15  ;;  %v1185_v24 = vsel %vm1178_vm4, %v1181_v29, %v1184_v56  ;;  %v1290_v16 = vsel %vm1283_vm1, %v1286_v39, %v1289_v45  ;;  %v1367_v4 = vsub.s32 32, %v1366_v9 }
  0xd3   :  { %v1368_v58 = vshll.u32 %v2588_v63, %v1366_v9  ;;  %v1186_v47 = vsel %vm1175_vm2, nan, %v1185_v24  ;;  %v1291_v51 = vsel %vm1175_vm2, nan, %v1290_v16  ;;  %v1371_v38 = vsub.s32 4294967266, %v1366_v9 }
  0xd4   :  { %v1553_v37 = vsel %vm1541_vm9, %v1535_v46, %v1552_v27  ;;  %1188 = vst [vmem:[#allocation5 + $0x58] sm:$0xff] %v1186_v47  ;;  %1293 = vst [vmem:[#allocation5 + $0x60] sm:$0xff] %v1291_v51  ;;  %v1369_v10 = vshrl.u32 %v1351_v26, %v1367_v4  ;;  %v2636_v50 = vmul.u32.u64.low %v1555_v3, %v1550_v44  ;;  %v2637_v49 = vmul.u32.u64.high %v1555_v3, %v1550_v44, %v2636_v50 }
  0xd5   :  { %v1554_v57 = vsel %vm1540_vm8, %v1551_v7, %v1553_v37  ;;  %v1372_v2 = vadd.s32 127, %v1371_v38  ;;  %v1562_v31 = vmul.u32 %v1555_v3, %v1546_v36  ;;  %v1381_v20 = vsub.s32 4, %v2574_v55 }
  0xd6   :  { %v2639_v19 = vmul.u32.u64.low %v1555_v3, %v1554_v57  ;;  %v2640_v52 = vmul.u32.u64.high %v1555_v3, %v1554_v57, %v2639_v19  ;;  %v1370_v40 = vor.u32 %v1369_v10, %v1368_v58  ;;  %v1565_v33 = vadd.s32 1, %v2637_v49 }
  0xd7   :  { %v1373_v48 = vshll.u32 %v1372_v2, 23  ;;  %vm1297_vm13 = vcmp.lt.s32.totalorder %v2326_v59, 0  ;;  %vm1296_vm14 = vcmp.le.f32.partialorder %v1295_v62, 0.7853982  ;;  %vm1387_vm6 = vweird.f32 %v2326_v59 }
  0xd8   :  { %v1377_v63 = vcvt.s32.f32 %v1370_v40  ;;  %vm1564_vm12 = vc.u32 %v2640_v52, %v2636_v50  ;;  %v1382_v18 = vsel %vm1297_vm13, %v1381_v20, %v2574_v55  ;;  %v1563_v55 = vadd.s32 %v2636_v50, %v2640_v52 }
  0xd9   :  { %v1374_v13 = vor.u32 4788187, %v1373_v48  ;;  %v1566_v23 = vsel %vm1564_vm12, %v1565_v33, %v2637_v49  ;;  %v1384_v12 = vsel %vm1296_vm14, 0, %v1382_v18  ;;  %vm1509_vm7 = vcmp.lt.s32.totalorder %v2472_v42, 0 }
  0xda   :  { %v1567_v35 = vadd.s32 %v1566_v23, %v1562_v31  ;;  %v1388_v17 = vadd.s32 3, %v1384_v12  ;;  %v1494_v54 = vand.u32 3, %v1384_v12  ;;  %vm1508_vm8 = vcmp.le.f32.partialorder %v1507_v14, 0.7853982 }
  0xdb   :  { %v1375_v60 = vand.u32 2147483647, %v1374_v13 }
  0xdc   :  { %v1568_v28 = vadd.s32 536870912, %v1567_v35  ;;  %v1389_v34 = vand.u32 3, %v1388_v17  ;;  %vm1495_vm15 = vcmp.lt.s32.totalorder %v1494_v54, 2  ;;  %vm1496_vm1 = vcmp.eq.s32.totalorder %v1494_v54, 0 }
  0xdd   :  { %v1378_v43 = vmul.f32 %v1377_v63, %v1375_v60  ;;  %vm1499_vm2 = vcmp.eq.s32.totalorder %v1494_v54, 2 }
  0xde   :  { %v1569_v6 = vshrl.u32 %v1568_v28, 30  ;;  %vm1394_vm0 = vcmp.eq.s32.totalorder %v1389_v34, 2  ;;  %vm1390_vm4 = vcmp.lt.s32.totalorder %v1389_v34, 2  ;;  %vm1391_vm5 = vcmp.eq.s32.totalorder %v1389_v34, 0 }
  0xdf   :  { %v1379_v30 = vxor.u32 2147483648, %v1378_v43 }
  0xe0   :  { %v1570_v32 = vshll.u32 %v1569_v6, 30 }
  0xe1   :  { %v1380_v8 = vsel %vm1297_vm13, %v1379_v30, %v1378_v43 }
  0xe2   :  { %v1383_v0 = vsel %vm1296_vm14, %v2326_v59, %v1380_v8  ;;  %v1571_v46 = vsub.s32 %v1567_v35, %v1570_v32  ;;  %v1593_v59 = vsub.s32 4, %v1569_v6 }
  0xe3   :  { %1865 = vcosq.f32 %v1383_v0 }
  0xe4   :  { %1867 = vsinq.f32 %v1383_v0  ;;  %v1573_v3 = vsub.s32 0, %v1571_v46  ;;  %v1594_v37 = vsel %vm1509_vm7, %v1593_v59, %v1569_v6 }
  0xe5   :  { %v1596_v50 = vsel %vm1508_vm8, 0, %v1594_v37 }
  0xe6   :  { %v1792_v26 = vmin.u32 %v1573_v3, %v1571_v46  ;;  %v1600_v49 = vadd.s32 3, %v1596_v50  ;;  %v1706_v19 = vand.u32 3, %v1596_v50 }
  0xe8   :  { %v1575_v41 = vclz %v1792_v26  ;;  %v1601_v2 = vand.u32 3, %v1600_v49  ;;  %vm1711_vm10 = vcmp.eq.s32.totalorder %v1706_v19, 2  ;;  %vm1708_vm12 = vcmp.eq.s32.totalorder %v1706_v19, 0 }
  0xe9   :  { %vm1707_vm14 = vcmp.lt.s32.totalorder %v1706_v19, 2 }
  0xea   :  { %v1793_v11 = vadd.s32 4294967294, %v1575_v41  ;;  %vm1606_vm9 = vcmp.eq.s32.totalorder %v1601_v2, 2  ;;  %vm1603_vm11 = vcmp.eq.s32.totalorder %v1601_v2, 0  ;;  %vm1602_vm13 = vcmp.lt.s32.totalorder %v1601_v2, 2 }
  0xec   :  { %vm1794_vm3 = vcmp.lt.s32.totalorder %v1793_v11, 0 }
  0xed   :  { %v1866_v62 = vpop.eup %1865  ;;  %v1578_v22 = vsel %vm1794_vm3, 0, %v1793_v11 }
  0xee   :  { %v1868_v7 = vpop.eup %1867  ;;  %v1395_v21 = vxor.u32 2147483648, %v1866_v62  ;;  %v1579_v61 = vsub.s32 32, %v1578_v22  ;;  %v1580_v25 = vshll.u32 %v1571_v46, %v1578_v22  ;;  %v1583_v1 = vsub.s32 4294967266, %v1578_v22 }
  0xef   :  { %v1392_v53 = vxor.u32 2147483648, %v1868_v7 }
  0xf0   :  { %v1396_v5 = vsel %vm1394_vm0, %v1395_v21, %v1868_v7  ;;  %v1501_v15 = vsel %vm1499_vm2, %v1395_v21, %v1868_v7  ;;  %v1581_v45 = vshrl.u32 %v1563_v55, %v1579_v61  ;;  %v1584_v36 = vadd.s32 127, %v1583_v1 }
  0xf1   :  { %v1393_v27 = vsel %vm1391_vm5, %v1866_v62, %v1392_v53  ;;  %v1498_v56 = vsel %vm1496_vm1, %v1866_v62, %v1392_v53 }
  0xf2   :  { %v1397_v29 = vsel %vm1390_vm4, %v1393_v27, %v1396_v5  ;;  %v1502_v39 = vsel %vm1495_vm15, %v1498_v56, %v1501_v15  ;;  %v1582_v24 = vor.u32 %v1581_v45, %v1580_v25  ;;  %v1585_v16 = vshll.u32 %v1584_v36, 23 }
  0xf3   :  { %v1398_v9 = vsel %vm1387_vm6, nan, %v1397_v29  ;;  %v1503_v44 = vsel %vm1387_vm6, nan, %v1502_v39  ;;  %vm1599_vm15 = vweird.f32 %v2472_v42 }
  0xf4   :  { %1400 = vst [vmem:[#allocation5 + $0x68] sm:$0xff] %v1398_v9  ;;  %1505 = vst [vmem:[#allocation5 + $0x70] sm:$0xff] %v1503_v44  ;;  %v1586_v4 = vor.u32 4788187, %v1585_v16  ;;  %v1589_v58 = vcvt.s32.f32 %v1582_v24 }
  0xf6   :  { %v1587_v47 = vand.u32 2147483647, %v1586_v4 }
  0xf8   :  { %v1590_v51 = vmul.f32 %v1589_v58, %v1587_v47 }
  0xfa   :  { %v1591_v38 = vxor.u32 2147483648, %v1590_v51 }
  0xfc   :  { %v1592_v10 = vsel %vm1509_vm7, %v1591_v38, %v1590_v51 }
  0xfd   :  { %v1595_v57 = vsel %vm1508_vm8, %v2472_v42, %v1592_v10 }
  0xfe   :  { %1869 = vcosq.f32 %v1595_v57 }
  0xff   :  { %1871 = vsinq.f32 %v1595_v57 }
 0x108   :  { %v1870_v52 = vpop.eup %1869 }
 0x109   :  { %v1872_v40 = vpop.eup %1871  ;;  %v1607_v48 = vxor.u32 2147483648, %v1870_v52 }
 0x10a   :  { %v1604_v14 = vxor.u32 2147483648, %v1872_v40 }
 0x10b   :  { %v1608_v31 = vsel %vm1606_vm9, %v1607_v48, %v1872_v40  ;;  %v1713_v33 = vsel %vm1711_vm10, %v1607_v48, %v1872_v40 }
 0x10c   :  { %v1605_v13 = vsel %vm1603_vm11, %v1870_v52, %v1604_v14  ;;  %v1710_v63 = vsel %vm1708_vm12, %v1870_v52, %v1604_v14 }
 0x10d   :  { %v1609_v23 = vsel %vm1602_vm13, %v1605_v13, %v1608_v31  ;;  %v1714_v60 = vsel %vm1707_vm14, %v1710_v63, %v1713_v33 }
 0x10e   :  { %v1610_v20 = vsel %vm1599_vm15, nan, %v1609_v23  ;;  %v1715_v35 = vsel %vm1599_vm15, nan, %v1714_v60 }
 0x10f   :  { %1612 = vst [vmem:[#allocation5 + $0x78] sm:$0xff] %v1610_v20  ;;  %1717 = vst [vmem:[#allocation5 + $0x80] sm:$0xff] %v1715_v35 }
 0x110   :  { %1907 = shalt.err (!%p1904_p12)
}
 0x111   :  { %s1908_s22 = scalar_lea.hbm %s2673_s1, 2176 }
 0x112   :  { %p1909_p13 = scmp.ne.s32.totalorder %s2673_s1, %s1908_s22  ;;  %p1912_p0 = scmp.lt.u32.totalorder %s1908_s22, %s2673_s1 }
 0x114   :  { %p1914_p1 = pnand %p1912_p0, %p1909_p13 }
 0x116   :  { %1917 = shalt.err (!%p1914_p1)
}
 0x117   :  { %s1930_s27 = smov 128   ;;  %s1931_s28 = smov 8  }
 0x118   :  { %1729 = dma.vmem_to_hbm [thread:$0]  %s1724_s18, 2176, %s2673_s1, [#allocation4], %s1930_s27, %s1930_s27, %s1931_s28  }
 0x119   :  { %1920 = dma.done.wait [#allocation4], 2176  }
 0x11a   :  { %1921 = vsyncadd [#allocation4], 4294965120 }
 0x11b   :  { %1733 = vsyncpa [#allocation3], 1 }
 0x11c   :  { %1734 = vsyncpa [#allocation4], 1 }

</bundles_post_ra>
